<compile_context>
chip_gen: v7x
topology: tpu7x:2x2x1
jax: 0.10.0
libtpu: 0.0.40
codegen_flags: <defaults>
</compile_context>

<pallas_src>
import functools

import jax
import jax.numpy as jnp
from jax.experimental import pallas as pl
from jax.experimental.pallas import tpu as pltpu

LEAKY_SLOPE = 0.2           # modules.LeakyReLU default (negative_slope=0.2)
BN_EPS = 1e-5               # nn.BatchNorm2d default eps
TM_MAX = 512                # M-tile rows for the tiled fallback path
FUSED_VMEM_BUDGET = 24 * 1024 * 1024   # bytes (double-buffer counted)


def _round_up(x, m):
    return (x + m - 1) // m * m


# ----------------------------- Pallas kernels -----------------------------

def _conv_lrelu_kernel(p_ref, w_ref, b_ref, o_ref):
    # block_0: im2col GEMM (bf16 operands, f32 acc) + bias + LeakyReLU fused.
    y = jnp.dot(p_ref[...], w_ref[...], preferred_element_type=jnp.float32)
    y = y + b_ref[...]
    o_ref[...] = jnp.where(y >= 0.0, y, LEAKY_SLOPE * y)


def _conv_bn_lrelu_kernel(p_ref, w_ref, b_ref, g_ref, bt_ref, o_ref, *, m_true):
    # Fully fused BN block (single grid step, whole problem VMEM-resident):
    #   conv GEMM + bias -> batch mean/var -> BN affine -> LeakyReLU.
    y = jnp.dot(p_ref[...], w_ref[...], preferred_element_type=jnp.float32)
    y = y + b_ref[...]

    m_pad = y.shape[0]
    if m_true < m_pad:  # static: mask rows added by M-padding out of the stats
        row = jax.lax.broadcasted_iota(jnp.int32, (m_pad, 1), 0)
        ym = jnp.where(row < m_true, y, 0.0)
    else:
        ym = y

    inv_m = 1.0 / float(m_true)
    s = jnp.sum(ym, axis=0, keepdims=True)            # (1, C) XLU reduce
    q = jnp.sum(ym * ym, axis=0, keepdims=True)
    mean = s * inv_m
    var = jnp.maximum(q * inv_m - mean * mean, 0.0)    # biased var, clamp >= 0
    inv_std = jax.lax.rsqrt(var + BN_EPS)              # EUP
    scale = g_ref[...] * inv_std                       # padded channels -> 0
    shift = bt_ref[...] - mean * scale

    z = y * scale + shift
    o_ref[...] = jnp.where(z >= 0.0, z, LEAKY_SLOPE * z)


def _conv_stats_kernel(p_ref, w_ref, b_ref, y_ref, s_ref, q_ref,
                       *, tm, m_true, m_pad):
    # Fallback pass 1: conv GEMM + bias, fused per-channel sum / sum^2 accum.
    i = pl.program_id(0)

    @pl.when(i == 0)
    def _init():
        s_ref[...] = jnp.zeros_like(s_ref)
        q_ref[...] = jnp.zeros_like(q_ref)

    y = jnp.dot(p_ref[...], w_ref[...], preferred_element_type=jnp.float32)
    y = y + b_ref[...]
    y_ref[...] = y

    c = y.shape[-1]
    if m_true < m_pad:  # static: mask rows added by M-padding out of the stats
        row = i * tm + jax.lax.broadcasted_iota(jnp.int32, (tm, 1), 0)
        ym = jnp.where(row < m_true, y, 0.0)
    else:
        ym = y
    # (TM, C) -> (TM//8, 8, C): accumulate sublane partials with VPU adds;
    # the final 8-row collapse happens once outside the kernel.
    ym3 = ym.reshape(tm // 8, 8, c)
    s_ref[...] += jnp.sum(ym3, axis=0)
    q_ref[...] += jnp.sum(ym3 * ym3, axis=0)


def _bn_lrelu_kernel(y_ref, scale_ref, shift_ref, o_ref):
    # Fallback pass 2: out = LeakyReLU(y * scale + shift).
    z = y_ref[...] * scale_ref[...] + shift_ref[...]
    o_ref[...] = jnp.where(z >= 0.0, z, LEAKY_SLOPE * z)


# ----------------------------- Pallas wrappers -----------------------------

def conv_lrelu(patches, w_flat, bias, tm):
    m_pad, k = patches.shape
    cout = w_flat.shape[1]
    return pl.pallas_call(
        _conv_lrelu_kernel,
        out_shape=jax.ShapeDtypeStruct((m_pad, cout), jnp.float32),
        grid=(m_pad // tm,),
        in_specs=[pl.BlockSpec((tm, k), lambda i: (i, 0)),
                  pl.BlockSpec((k, cout), lambda i: (0, 0)),
                  pl.BlockSpec((1, cout), lambda i: (0, 0))],
        out_specs=pl.BlockSpec((tm, cout), lambda i: (i, 0)),
        compiler_params=pltpu.CompilerParams(
            dimension_semantics=("parallel",)),
        cost_estimate=pl.CostEstimate(
            flops=2 * m_pad * k * cout,
            transcendentals=0,
            bytes_accessed=m_pad * k * 2 + k * cout * 2 + m_pad * cout * 4),
    )(patches, w_flat, bias.reshape(1, cout))


def conv_bn_lrelu(patches, w_flat, bias, gamma, beta, m_true):
    m_pad, k = patches.shape
    cout = w_flat.shape[1]
    kern = functools.partial(_conv_bn_lrelu_kernel, m_true=m_true)
    return pl.pallas_call(
        kern,
        out_shape=jax.ShapeDtypeStruct((m_pad, cout), jnp.float32),
        grid=(1,),
        in_specs=[pl.BlockSpec((m_pad, k), lambda i: (0, 0)),
                  pl.BlockSpec((k, cout), lambda i: (0, 0)),
                  pl.BlockSpec((1, cout), lambda i: (0, 0)),
                  pl.BlockSpec((1, cout), lambda i: (0, 0)),
                  pl.BlockSpec((1, cout), lambda i: (0, 0))],
        out_specs=pl.BlockSpec((m_pad, cout), lambda i: (0, 0)),
        compiler_params=pltpu.CompilerParams(
            dimension_semantics=("arbitrary",),
            vmem_limit_bytes=48 * 1024 * 1024),
        cost_estimate=pl.CostEstimate(
            flops=2 * m_pad * k * cout + 8 * m_pad * cout,
            transcendentals=cout,
            bytes_accessed=m_pad * k * 2 + k * cout * 2 + m_pad * cout * 4),
    )(patches, w_flat, bias.reshape(1, cout),
      gamma.reshape(1, cout), beta.reshape(1, cout))


def conv_stats(patches, w_flat, bias, m_true, tm):
    m_pad, k = patches.shape
    cout = w_flat.shape[1]
    kern = functools.partial(_conv_stats_kernel, tm=tm, m_true=m_true,
                             m_pad=m_pad)
    return pl.pallas_call(
        kern,
        out_shape=(jax.ShapeDtypeStruct((m_pad, cout), jnp.float32),
                   jax.ShapeDtypeStruct((8, cout), jnp.float32),
                   jax.ShapeDtypeStruct((8, cout), jnp.float32)),
        grid=(m_pad // tm,),
        in_specs=[pl.BlockSpec((tm, k), lambda i: (i, 0)),
                  pl.BlockSpec((k, cout), lambda i: (0, 0)),
                  pl.BlockSpec((1, cout), lambda i: (0, 0))],
        out_specs=(pl.BlockSpec((tm, cout), lambda i: (i, 0)),
                   pl.BlockSpec((8, cout), lambda i: (0, 0)),
                   pl.BlockSpec((8, cout), lambda i: (0, 0))),
        # M is the reduction axis for the resident stats accumulators.
        compiler_params=pltpu.CompilerParams(
            dimension_semantics=("arbitrary",)),
        cost_estimate=pl.CostEstimate(
            flops=2 * m_pad * k * cout + 4 * m_pad * cout,
            transcendentals=0,
            bytes_accessed=m_pad * k * 2 + k * cout * 2 + m_pad * cout * 4),
    )(patches, w_flat, bias.reshape(1, cout))


def bn_lrelu(y, scale, shift, tm):
    m_pad, cout = y.shape
    return pl.pallas_call(
        _bn_lrelu_kernel,
        out_shape=jax.ShapeDtypeStruct((m_pad, cout), jnp.float32),
        grid=(m_pad // tm,),
        in_specs=[pl.BlockSpec((tm, cout), lambda i: (i, 0)),
                  pl.BlockSpec((1, cout), lambda i: (0, 0)),
                  pl.BlockSpec((1, cout), lambda i: (0, 0))],
        out_specs=pl.BlockSpec((tm, cout), lambda i: (i, 0)),
        compiler_params=pltpu.CompilerParams(
            dimension_semantics=("parallel",)),
    )(y, scale.reshape(1, cout), shift.reshape(1, cout))


# --------------------------------- Glue ------------------------------------

def im2col(x_nhwc, stride):
    """3x3 patches (pad=1) -> (N*Ho*Wo, 9*C). Layout glue, fused by XLA in-jit."""
    N, H, W, C = x_nhwc.shape
    xp = jnp.pad(x_nhwc, ((0, 0), (1, 1), (1, 1), (0, 0)))
    Ho = (H + 2 - 3) // stride + 1
    Wo = (W + 2 - 3) // stride + 1
    cols = []
    for kh in range(3):
        for kw in range(3):
            sl = jax.lax.slice(
                xp,
                (0, kh, kw, 0),
                (N, kh + (Ho - 1) * stride + 1, kw + (Wo - 1) * stride + 1, C),
                (1, stride, stride, 1))
            cols.append(sl)
    patches = jnp.concatenate(cols, axis=-1)          # (N, Ho, Wo, 9*C)
    return patches.reshape(N * Ho * Wo, 9 * C), Ho, Wo


def _pad_patches(patches, m_pad, k_pad):
    M, K = patches.shape
    p = jnp.zeros((m_pad, k_pad), jnp.bfloat16)
    return p.at[:M, :K].set(patches.astype(jnp.bfloat16))


def block_forward(x_nhwc, params, stride, use_norm):
    N, _, _, Cin = x_nhwc.shape
    Cout = params["b"].shape[0]
    patches, Ho, Wo = im2col(x_nhwc, stride)
    M, K = patches.shape

    # TPU-friendly padding: K and Cout to multiples of 128 (lane-dense, full
    # MXU columns).  Zero-padding is exact for the GEMM.
    K_pad = _round_up(K, 128)
    C_pad = _round_up(Cout, 128)

    # bf16 GEMM operands (f32 accumulation inside the kernel); bias stays f32.
    w_p = jnp.zeros((K_pad, C_pad), jnp.bfloat16)
    w_p = w_p.at[:K, :Cout].set(
        params["w"].reshape(K, Cout).astype(jnp.bfloat16))
    b_p = jnp.zeros((C_pad,), jnp.float32).at[:Cout].set(params["b"])

    if not use_norm:
        TM = min(TM_MAX, _round_up(M, 32))
        M_pad = _round_up(M, TM)
        out = conv_lrelu(_pad_patches(patches, M_pad, K_pad), w_p, b_p, TM)
    else:
        gamma = jnp.zeros((C_pad,), jnp.float32).at[:Cout].set(params["gamma"])
        beta = jnp.zeros((C_pad,), jnp.float32).at[:Cout].set(params["beta"])

        M_pad = _round_up(M, 8)
        # Conservative VMEM estimate (double-buffer factor 2 on all specs).
        fused_bytes = (2 * (M_pad * K_pad * 2 + K_pad * C_pad * 2
                            + 3 * C_pad * 4)
                       + 2 * M_pad * C_pad * 4)
        if fused_bytes <= FUSED_VMEM_BUDGET:
            # Single fused kernel: conv + batch stats + BN + LeakyReLU.
            out = conv_bn_lrelu(_pad_patches(patches, M_pad, K_pad),
                                w_p, b_p, gamma, beta, M)
        else:
            # Two-pass fallback for large activations.
            TM = min(TM_MAX, _round_up(M, 32))
            M_pad = _round_up(M, TM)
            y, s8, q8 = conv_stats(_pad_patches(patches, M_pad, K_pad),
                                   w_p, b_p, M, TM)
            s = jnp.sum(s8, axis=0)                    # collapse 8 sublane rows
            q = jnp.sum(q8, axis=0)
            mean = s / M
            var = jnp.maximum(q / M - mean * mean, 0.0)
            inv_std = jax.lax.rsqrt(var + BN_EPS)
            scale = gamma * inv_std                    # padded channels -> 0
            shift = beta - mean * scale
            out = bn_lrelu(y, scale, shift, TM)

    return out[:M, :Cout].reshape(N, Ho, Wo, Cout)


def strided_conv_encoder(x_nchw, params_list, layers):
    # I/O in NCHW (PyTorch convention); compute in NHWC / flattened GEMM form.
    x = jnp.transpose(x_nchw, (0, 2, 3, 1)).astype(jnp.float32)
    x = block_forward(x, params_list[0], stride=1, use_norm=False)
    for i in range(1, len(layers) - 1):
        in_ch, out_ch = layers[i], layers[i + 1]
        x = block_forward(x, params_list[i], stride=out_ch // in_ch,
                          use_norm=True)
    return jnp.transpose(x, (0, 3, 1, 2))


def init_params(key, layers):
    """Deterministic synthetic init (PyTorch-like uniform conv, default BN)."""
    params = []
    for i, (cin, cout) in enumerate(zip(layers[:-1], layers[1:])):
        k = jax.random.fold_in(key, i)
        kw_, kb = jax.random.split(k)
        bound = 1.0 / jnp.sqrt(9.0 * cin)
        p = {
            "w": jax.random.uniform(kw_, (3, 3, cin, cout), jnp.float32,
                                    -bound, bound),
            "b": jax.random.uniform(kb, (cout,), jnp.float32, -bound, bound),
        }
        if i > 0:  # blocks with BatchNorm
            p["gamma"] = jnp.ones((cout,), jnp.float32)   # PyTorch default
            p["beta"] = jnp.zeros((cout,), jnp.float32)   # PyTorch default
        params.append(p)
    return params


if __name__ == "__main__":
    # layers=(4, 32, 64, 128, 128), input NCHW = (2, 4, 16, 16)
    #   -> strides (1, 2, 2, 1) -> output (2, 128, 4, 4).
    layers = (4, 32, 64, 128, 128)
    key = jax.random.PRNGKey(0)
    kx, kp = jax.random.split(key)
    x = jax.random.normal(kx, (2, 4, 16, 16), jnp.float32)
    params = init_params(kp, layers)

    fwd = jax.jit(lambda xx, pp: strided_conv_encoder(xx, pp, layers))
    out = fwd(x, params)
    jax.block_until_ready(out)
    assert out.shape == (2, 128, 4, 4), out.shape
    assert out.dtype == jnp.float32
    print("KERNEL_OK")
</pallas_src>

<mosaic_0001>
module attributes {stable_mosaic.version = 11 : i64} {
  func.func @_conv_lrelu_kernel(%arg0: i32, %arg1: memref<512x128xbf16, #tpu.memory_space<vmem>>, %arg2: memref<128x128xbf16, #tpu.memory_space<vmem>>, %arg3: memref<1x128xf32, #tpu.memory_space<vmem>>, %arg4: memref<512x128xf32, #tpu.memory_space<vmem>>) attributes {dimension_semantics = [#tpu.dimension_semantics<parallel>], iteration_bounds = array<i64: 1>, scalar_prefetch = 0 : i64, scratch_operands = 0 : i64, tpu.core_type = #tpu.core_type<tc>, window_params = [{transform_indices = @transform_0, window_bounds = array<i64: 512, 128>}, {pipeline_mode = #tpu.pipeline_mode<synchronous>, transform_indices = @transform_1, window_bounds = array<i64: 128, 128>}, {pipeline_mode = #tpu.pipeline_mode<synchronous>, transform_indices = @transform_2, window_bounds = array<i64: 1, 128>}, {transform_indices = @transform_3, window_bounds = array<i64: 512, 128>}]} {
    %c0 = arith.constant 0 : index
    %c0_0 = arith.constant 0 : index
    %0 = vector.load %arg1[%c0, %c0_0] : memref<512x128xbf16, #tpu.memory_space<vmem>>, vector<512x128xbf16>
    %c0_1 = arith.constant 0 : index
    %c0_2 = arith.constant 0 : index
    %1 = vector.load %arg2[%c0_1, %c0_2] : memref<128x128xbf16, #tpu.memory_space<vmem>>, vector<128x128xbf16>
    %cst = arith.constant dense<0.000000e+00> : vector<512x128xf32>
    %2 = tpu.matmul %0, %1, %cst {dimension_numbers = #tpu.dot_dimension_numbers<[1], [0], [0], [1], [0, 0, 1, 1], [], []>} : vector<512x128xbf16>, vector<128x128xbf16>, vector<512x128xf32> -> vector<512x128xf32>
    %c0_3 = arith.constant 0 : index
    %c0_4 = arith.constant 0 : index
    %3 = vector.load %arg3[%c0_3, %c0_4] : memref<1x128xf32, #tpu.memory_space<vmem>>, vector<1x128xf32>
    %4 = vector.broadcast %3 : vector<1x128xf32> to vector<512x128xf32>
    %5 = arith.addf %2, %4 : vector<512x128xf32>
    %cst_5 = arith.constant 0.000000e+00 : f32
    %6 = vector.broadcast %cst_5 : f32 to vector<512x128xf32>
    %7 = arith.cmpf oge, %5, %6 : vector<512x128xf32>
    %cst_6 = arith.constant 2.000000e-01 : f32
    %8 = vector.broadcast %cst_6 : f32 to vector<512x128xf32>
    %9 = arith.mulf %8, %5 : vector<512x128xf32>
    %10 = arith.select %7, %5, %9 : vector<512x128xi1>, vector<512x128xf32>
    %c0_7 = arith.constant 0 : index
    %c0_8 = arith.constant 0 : index
    %11 = vector.load %arg4[%c0_7, %c0_8] : memref<512x128xf32, #tpu.memory_space<vmem>>, vector<512x128xf32>
    tpu.vector_store %arg4[%c0_7, %c0_8], %10 {strides = array<i32>} : memref<512x128xf32, #tpu.memory_space<vmem>>, vector<512x128xf32>,
    return
  }
  func.func @transform_0(%arg0: i32) -> (i32, i32) {
    %c0_i32 = arith.constant 0 : i32
    %c0_i32_0 = arith.constant 0 : i32
    return %arg0, %c0_i32 : i32, i32
  }
  func.func @transform_1(%arg0: i32) -> (i32, i32) {
    %c0_i32 = arith.constant 0 : i32
    %c0_i32_0 = arith.constant 0 : i32
    %c0_i32_1 = arith.constant 0 : i32
    return %c0_i32, %c0_i32_0 : i32, i32
  }
  func.func @transform_2(%arg0: i32) -> (i32, i32) {
    %c0_i32 = arith.constant 0 : i32
    %c0_i32_0 = arith.constant 0 : i32
    %c0_i32_1 = arith.constant 0 : i32
    return %c0_i32, %c0_i32_0 : i32, i32
  }
  func.func @transform_3(%arg0: i32) -> (i32, i32) {
    %c0_i32 = arith.constant 0 : i32
    %c0_i32_0 = arith.constant 0 : i32
    return %arg0, %c0_i32 : i32, i32
  }
}

module attributes {stable_mosaic.version = 11 : i64} {
  func.func @_conv_bn_lrelu_kernel(%arg0: i32, %arg1: memref<128x384xbf16, #tpu.memory_space<vmem>>, %arg2: memref<384x128xbf16, #tpu.memory_space<vmem>>, %arg3: memref<1x128xf32, #tpu.memory_space<vmem>>, %arg4: memref<1x128xf32, #tpu.memory_space<vmem>>, %arg5: memref<1x128xf32, #tpu.memory_space<vmem>>, %arg6: memref<128x128xf32, #tpu.memory_space<vmem>>) attributes {dimension_semantics = [#tpu.dimension_semantics<arbitrary>], iteration_bounds = array<i64: 1>, scalar_prefetch = 0 : i64, scratch_operands = 0 : i64, tpu.core_type = #tpu.core_type<tc>, window_params = [{pipeline_mode = #tpu.pipeline_mode<synchronous>, transform_indices = @transform_0, window_bounds = array<i64: 128, 384>}, {pipeline_mode = #tpu.pipeline_mode<synchronous>, transform_indices = @transform_1, window_bounds = array<i64: 384, 128>}, {pipeline_mode = #tpu.pipeline_mode<synchronous>, transform_indices = @transform_2, window_bounds = array<i64: 1, 128>}, {pipeline_mode = #tpu.pipeline_mode<synchronous>, transform_indices = @transform_3, window_bounds = array<i64: 1, 128>}, {pipeline_mode = #tpu.pipeline_mode<synchronous>, transform_indices = @transform_4, window_bounds = array<i64: 1, 128>}, {pipeline_mode = #tpu.pipeline_mode<synchronous>, transform_indices = @transform_5, window_bounds = array<i64: 128, 128>}]} {
    %c0 = arith.constant 0 : index
    %c0_0 = arith.constant 0 : index
    %0 = vector.load %arg1[%c0, %c0_0] : memref<128x384xbf16, #tpu.memory_space<vmem>>, vector<128x384xbf16>
    %c0_1 = arith.constant 0 : index
    %c0_2 = arith.constant 0 : index
    %1 = vector.load %arg2[%c0_1, %c0_2] : memref<384x128xbf16, #tpu.memory_space<vmem>>, vector<384x128xbf16>
    %cst = arith.constant dense<0.000000e+00> : vector<128x128xf32>
    %2 = tpu.matmul %0, %1, %cst {dimension_numbers = #tpu.dot_dimension_numbers<[1], [0], [0], [1], [0, 0, 1, 1], [], []>} : vector<128x384xbf16>, vector<384x128xbf16>, vector<128x128xf32> -> vector<128x128xf32>
    %c0_3 = arith.constant 0 : index
    %c0_4 = arith.constant 0 : index
    %3 = vector.load %arg3[%c0_3, %c0_4] : memref<1x128xf32, #tpu.memory_space<vmem>>, vector<1x128xf32>
    %4 = vector.broadcast %3 : vector<1x128xf32> to vector<128x128xf32>
    %5 = arith.addf %2, %4 : vector<128x128xf32>
    %cst_5 = arith.constant dense<0.000000e+00> : vector<128xf32>
    %6 = vector.multi_reduction <add>, %5, %cst_5 [0] : vector<128x128xf32> to vector<128xf32>
    %7 = vector.shape_cast %6 : vector<128xf32> to vector<1x128xf32>
    %8 = arith.mulf %5, %5 : vector<128x128xf32>
    %cst_6 = arith.constant dense<0.000000e+00> : vector<128xf32>
    %9 = vector.multi_reduction <add>, %8, %cst_6 [0] : vector<128x128xf32> to vector<128xf32>
    %10 = vector.shape_cast %9 : vector<128xf32> to vector<1x128xf32>
    %cst_7 = arith.constant 7.812500e-03 : f32
    %11 = vector.broadcast %cst_7 : f32 to vector<1x128xf32>
    %12 = arith.mulf %7, %11 : vector<1x128xf32>
    %cst_8 = arith.constant 7.812500e-03 : f32
    %13 = vector.broadcast %cst_8 : f32 to vector<1x128xf32>
    %14 = arith.mulf %10, %13 : vector<1x128xf32>
    %15 = arith.mulf %12, %12 : vector<1x128xf32>
    %16 = arith.subf %14, %15 : vector<1x128xf32>
    %cst_9 = arith.constant 0.000000e+00 : f32
    %17 = vector.broadcast %cst_9 : f32 to vector<1x128xf32>
    %18 = arith.maximumf %16, %17 : vector<1x128xf32>
    %cst_10 = arith.constant 9.99999974E-6 : f32
    %19 = vector.broadcast %cst_10 : f32 to vector<1x128xf32>
    %20 = arith.addf %18, %19 : vector<1x128xf32>
    %21 = math.rsqrt %20 : vector<1x128xf32>
    %c0_11 = arith.constant 0 : index
    %c0_12 = arith.constant 0 : index
    %22 = vector.load %arg4[%c0_11, %c0_12] : memref<1x128xf32, #tpu.memory_space<vmem>>, vector<1x128xf32>
    %23 = arith.mulf %22, %21 : vector<1x128xf32>
    %c0_13 = arith.constant 0 : index
    %c0_14 = arith.constant 0 : index
    %24 = vector.load %arg5[%c0_13, %c0_14] : memref<1x128xf32, #tpu.memory_space<vmem>>, vector<1x128xf32>
    %25 = arith.mulf %12, %23 : vector<1x128xf32>
    %26 = arith.subf %24, %25 : vector<1x128xf32>
    %27 = vector.broadcast %23 : vector<1x128xf32> to vector<128x128xf32>
    %28 = arith.mulf %5, %27 : vector<128x128xf32>
    %29 = vector.broadcast %26 : vector<1x128xf32> to vector<128x128xf32>
    %30 = arith.addf %28, %29 : vector<128x128xf32>
    %cst_15 = arith.constant 0.000000e+00 : f32
    %31 = vector.broadcast %cst_15 : f32 to vector<128x128xf32>
    %32 = arith.cmpf oge, %30, %31 : vector<128x128xf32>
    %cst_16 = arith.constant 2.000000e-01 : f32
    %33 = vector.broadcast %cst_16 : f32 to vector<128x128xf32>
    %34 = arith.mulf %33, %30 : vector<128x128xf32>
    %35 = arith.select %32, %30, %34 : vector<128x128xi1>, vector<128x128xf32>
    %c0_17 = arith.constant 0 : index
    %c0_18 = arith.constant 0 : index
    %36 = vector.load %arg6[%c0_17, %c0_18] : memref<128x128xf32, #tpu.memory_space<vmem>>, vector<128x128xf32>
    tpu.vector_store %arg6[%c0_17, %c0_18], %35 {strides = array<i32>} : memref<128x128xf32, #tpu.memory_space<vmem>>, vector<128x128xf32>,
    return
  }
  func.func @transform_0(%arg0: i32) -> (i32, i32) {
    %c0_i32 = arith.constant 0 : i32
    %c0_i32_0 = arith.constant 0 : i32
    %c0_i32_1 = arith.constant 0 : i32
    return %c0_i32, %c0_i32_0 : i32, i32
  }
  func.func @transform_1(%arg0: i32) -> (i32, i32) {
    %c0_i32 = arith.constant 0 : i32
    %c0_i32_0 = arith.constant 0 : i32
    %c0_i32_1 = arith.constant 0 : i32
    return %c0_i32, %c0_i32_0 : i32, i32
  }
  func.func @transform_2(%arg0: i32) -> (i32, i32) {
    %c0_i32 = arith.constant 0 : i32
    %c0_i32_0 = arith.constant 0 : i32
    %c0_i32_1 = arith.constant 0 : i32
    return %c0_i32, %c0_i32_0 : i32, i32
  }
  func.func @transform_3(%arg0: i32) -> (i32, i32) {
    %c0_i32 = arith.constant 0 : i32
    %c0_i32_0 = arith.constant 0 : i32
    %c0_i32_1 = arith.constant 0 : i32
    return %c0_i32, %c0_i32_0 : i32, i32
  }
  func.func @transform_4(%arg0: i32) -> (i32, i32) {
    %c0_i32 = arith.constant 0 : i32
    %c0_i32_0 = arith.constant 0 : i32
    %c0_i32_1 = arith.constant 0 : i32
    return %c0_i32, %c0_i32_0 : i32, i32
  }
  func.func @transform_5(%arg0: i32) -> (i32, i32) {
    %c0_i32 = arith.constant 0 : i32
    %c0_i32_0 = arith.constant 0 : i32
    %c0_i32_1 = arith.constant 0 : i32
    return %c0_i32, %c0_i32_0 : i32, i32
  }
}

module attributes {stable_mosaic.version = 11 : i64} {
  func.func @_conv_bn_lrelu_kernel(%arg0: i32, %arg1: memref<32x640xbf16, #tpu.memory_space<vmem>>, %arg2: memref<640x128xbf16, #tpu.memory_space<vmem>>, %arg3: memref<1x128xf32, #tpu.memory_space<vmem>>, %arg4: memref<1x128xf32, #tpu.memory_space<vmem>>, %arg5: memref<1x128xf32, #tpu.memory_space<vmem>>, %arg6: memref<32x128xf32, #tpu.memory_space<vmem>>) attributes {dimension_semantics = [#tpu.dimension_semantics<arbitrary>], iteration_bounds = array<i64: 1>, scalar_prefetch = 0 : i64, scratch_operands = 0 : i64, tpu.core_type = #tpu.core_type<tc>, window_params = [{pipeline_mode = #tpu.pipeline_mode<synchronous>, transform_indices = @transform_0, window_bounds = array<i64: 32, 640>}, {pipeline_mode = #tpu.pipeline_mode<synchronous>, transform_indices = @transform_1, window_bounds = array<i64: 640, 128>}, {pipeline_mode = #tpu.pipeline_mode<synchronous>, transform_indices = @transform_2, window_bounds = array<i64: 1, 128>}, {pipeline_mode = #tpu.pipeline_mode<synchronous>, transform_indices = @transform_3, window_bounds = array<i64: 1, 128>}, {pipeline_mode = #tpu.pipeline_mode<synchronous>, transform_indices = @transform_4, window_bounds = array<i64: 1, 128>}, {pipeline_mode = #tpu.pipeline_mode<synchronous>, transform_indices = @transform_5, window_bounds = array<i64: 32, 128>}]} {
    %c0 = arith.constant 0 : index
    %c0_0 = arith.constant 0 : index
    %0 = vector.load %arg1[%c0, %c0_0] : memref<32x640xbf16, #tpu.memory_space<vmem>>, vector<32x640xbf16>
    %c0_1 = arith.constant 0 : index
    %c0_2 = arith.constant 0 : index
    %1 = vector.load %arg2[%c0_1, %c0_2] : memref<640x128xbf16, #tpu.memory_space<vmem>>, vector<640x128xbf16>
    %cst = arith.constant dense<0.000000e+00> : vector<32x128xf32>
    %2 = tpu.matmul %0, %1, %cst {dimension_numbers = #tpu.dot_dimension_numbers<[1], [0], [0], [1], [0, 0, 1, 1], [], []>} : vector<32x640xbf16>, vector<640x128xbf16>, vector<32x128xf32> -> vector<32x128xf32>
    %c0_3 = arith.constant 0 : index
    %c0_4 = arith.constant 0 : index
    %3 = vector.load %arg3[%c0_3, %c0_4] : memref<1x128xf32, #tpu.memory_space<vmem>>, vector<1x128xf32>
    %4 = vector.broadcast %3 : vector<1x128xf32> to vector<32x128xf32>
    %5 = arith.addf %2, %4 : vector<32x128xf32>
    %cst_5 = arith.constant dense<0.000000e+00> : vector<128xf32>
    %6 = vector.multi_reduction <add>, %5, %cst_5 [0] : vector<32x128xf32> to vector<128xf32>
    %7 = vector.shape_cast %6 : vector<128xf32> to vector<1x128xf32>
    %8 = arith.mulf %5, %5 : vector<32x128xf32>
    %cst_6 = arith.constant dense<0.000000e+00> : vector<128xf32>
    %9 = vector.multi_reduction <add>, %8, %cst_6 [0] : vector<32x128xf32> to vector<128xf32>
    %10 = vector.shape_cast %9 : vector<128xf32> to vector<1x128xf32>
    %cst_7 = arith.constant 3.125000e-02 : f32
    %11 = vector.broadcast %cst_7 : f32 to vector<1x128xf32>
    %12 = arith.mulf %7, %11 : vector<1x128xf32>
    %cst_8 = arith.constant 3.125000e-02 : f32
    %13 = vector.broadcast %cst_8 : f32 to vector<1x128xf32>
    %14 = arith.mulf %10, %13 : vector<1x128xf32>
    %15 = arith.mulf %12, %12 : vector<1x128xf32>
    %16 = arith.subf %14, %15 : vector<1x128xf32>
    %cst_9 = arith.constant 0.000000e+00 : f32
    %17 = vector.broadcast %cst_9 : f32 to vector<1x128xf32>
    %18 = arith.maximumf %16, %17 : vector<1x128xf32>
    %cst_10 = arith.constant 9.99999974E-6 : f32
    %19 = vector.broadcast %cst_10 : f32 to vector<1x128xf32>
    %20 = arith.addf %18, %19 : vector<1x128xf32>
    %21 = math.rsqrt %20 : vector<1x128xf32>
    %c0_11 = arith.constant 0 : index
    %c0_12 = arith.constant 0 : index
    %22 = vector.load %arg4[%c0_11, %c0_12] : memref<1x128xf32, #tpu.memory_space<vmem>>, vector<1x128xf32>
    %23 = arith.mulf %22, %21 : vector<1x128xf32>
    %c0_13 = arith.constant 0 : index
    %c0_14 = arith.constant 0 : index
    %24 = vector.load %arg5[%c0_13, %c0_14] : memref<1x128xf32, #tpu.memory_space<vmem>>, vector<1x128xf32>
    %25 = arith.mulf %12, %23 : vector<1x128xf32>
    %26 = arith.subf %24, %25 : vector<1x128xf32>
    %27 = vector.broadcast %23 : vector<1x128xf32> to vector<32x128xf32>
    %28 = arith.mulf %5, %27 : vector<32x128xf32>
    %29 = vector.broadcast %26 : vector<1x128xf32> to vector<32x128xf32>
    %30 = arith.addf %28, %29 : vector<32x128xf32>
    %cst_15 = arith.constant 0.000000e+00 : f32
    %31 = vector.broadcast %cst_15 : f32 to vector<32x128xf32>
    %32 = arith.cmpf oge, %30, %31 : vector<32x128xf32>
    %cst_16 = arith.constant 2.000000e-01 : f32
    %33 = vector.broadcast %cst_16 : f32 to vector<32x128xf32>
    %34 = arith.mulf %33, %30 : vector<32x128xf32>
    %35 = arith.select %32, %30, %34 : vector<32x128xi1>, vector<32x128xf32>
    %c0_17 = arith.constant 0 : index
    %c0_18 = arith.constant 0 : index
    %36 = vector.load %arg6[%c0_17, %c0_18] : memref<32x128xf32, #tpu.memory_space<vmem>>, vector<32x128xf32>
    tpu.vector_store %arg6[%c0_17, %c0_18], %35 {strides = array<i32>} : memref<32x128xf32, #tpu.memory_space<vmem>>, vector<32x128xf32>,
    return
  }
  func.func @transform_0(%arg0: i32) -> (i32, i32) {
    %c0_i32 = arith.constant 0 : i32
    %c0_i32_0 = arith.constant 0 : i32
    %c0_i32_1 = arith.constant 0 : i32
    return %c0_i32, %c0_i32_0 : i32, i32
  }
  func.func @transform_1(%arg0: i32) -> (i32, i32) {
    %c0_i32 = arith.constant 0 : i32
    %c0_i32_0 = arith.constant 0 : i32
    %c0_i32_1 = arith.constant 0 : i32
    return %c0_i32, %c0_i32_0 : i32, i32
  }
  func.func @transform_2(%arg0: i32) -> (i32, i32) {
    %c0_i32 = arith.constant 0 : i32
    %c0_i32_0 = arith.constant 0 : i32
    %c0_i32_1 = arith.constant 0 : i32
    return %c0_i32, %c0_i32_0 : i32, i32
  }
  func.func @transform_3(%arg0: i32) -> (i32, i32) {
    %c0_i32 = arith.constant 0 : i32
    %c0_i32_0 = arith.constant 0 : i32
    %c0_i32_1 = arith.constant 0 : i32
    return %c0_i32, %c0_i32_0 : i32, i32
  }
  func.func @transform_4(%arg0: i32) -> (i32, i32) {
    %c0_i32 = arith.constant 0 : i32
    %c0_i32_0 = arith.constant 0 : i32
    %c0_i32_1 = arith.constant 0 : i32
    return %c0_i32, %c0_i32_0 : i32, i32
  }
  func.func @transform_5(%arg0: i32) -> (i32, i32) {
    %c0_i32 = arith.constant 0 : i32
    %c0_i32_0 = arith.constant 0 : i32
    %c0_i32_1 = arith.constant 0 : i32
    return %c0_i32, %c0_i32_0 : i32, i32
  }
}

module attributes {stable_mosaic.version = 11 : i64} {
  func.func @_conv_bn_lrelu_kernel(%arg0: i32, %arg1: memref<32x1152xbf16, #tpu.memory_space<vmem>>, %arg2: memref<1152x128xbf16, #tpu.memory_space<vmem>>, %arg3: memref<1x128xf32, #tpu.memory_space<vmem>>, %arg4: memref<1x128xf32, #tpu.memory_space<vmem>>, %arg5: memref<1x128xf32, #tpu.memory_space<vmem>>, %arg6: memref<32x128xf32, #tpu.memory_space<vmem>>) attributes {dimension_semantics = [#tpu.dimension_semantics<arbitrary>], iteration_bounds = array<i64: 1>, scalar_prefetch = 0 : i64, scratch_operands = 0 : i64, tpu.core_type = #tpu.core_type<tc>, window_params = [{pipeline_mode = #tpu.pipeline_mode<synchronous>, transform_indices = @transform_0, window_bounds = array<i64: 32, 1152>}, {pipeline_mode = #tpu.pipeline_mode<synchronous>, transform_indices = @transform_1, window_bounds = array<i64: 1152, 128>}, {pipeline_mode = #tpu.pipeline_mode<synchronous>, transform_indices = @transform_2, window_bounds = array<i64: 1, 128>}, {pipeline_mode = #tpu.pipeline_mode<synchronous>, transform_indices = @transform_3, window_bounds = array<i64: 1, 128>}, {pipeline_mode = #tpu.pipeline_mode<synchronous>, transform_indices = @transform_4, window_bounds = array<i64: 1, 128>}, {pipeline_mode = #tpu.pipeline_mode<synchronous>, transform_indices = @transform_5, window_bounds = array<i64: 32, 128>}]} {
    %c0 = arith.constant 0 : index
    %c0_0 = arith.constant 0 : index
    %0 = vector.load %arg1[%c0, %c0_0] : memref<32x1152xbf16, #tpu.memory_space<vmem>>, vector<32x1152xbf16>
    %c0_1 = arith.constant 0 : index
    %c0_2 = arith.constant 0 : index
    %1 = vector.load %arg2[%c0_1, %c0_2] : memref<1152x128xbf16, #tpu.memory_space<vmem>>, vector<1152x128xbf16>
    %cst = arith.constant dense<0.000000e+00> : vector<32x128xf32>
    %2 = tpu.matmul %0, %1, %cst {dimension_numbers = #tpu.dot_dimension_numbers<[1], [0], [0], [1], [0, 0, 1, 1], [], []>} : vector<32x1152xbf16>, vector<1152x128xbf16>, vector<32x128xf32> -> vector<32x128xf32>
    %c0_3 = arith.constant 0 : index
    %c0_4 = arith.constant 0 : index
    %3 = vector.load %arg3[%c0_3, %c0_4] : memref<1x128xf32, #tpu.memory_space<vmem>>, vector<1x128xf32>
    %4 = vector.broadcast %3 : vector<1x128xf32> to vector<32x128xf32>
    %5 = arith.addf %2, %4 : vector<32x128xf32>
    %cst_5 = arith.constant dense<0.000000e+00> : vector<128xf32>
    %6 = vector.multi_reduction <add>, %5, %cst_5 [0] : vector<32x128xf32> to vector<128xf32>
    %7 = vector.shape_cast %6 : vector<128xf32> to vector<1x128xf32>
    %8 = arith.mulf %5, %5 : vector<32x128xf32>
    %cst_6 = arith.constant dense<0.000000e+00> : vector<128xf32>
    %9 = vector.multi_reduction <add>, %8, %cst_6 [0] : vector<32x128xf32> to vector<128xf32>
    %10 = vector.shape_cast %9 : vector<128xf32> to vector<1x128xf32>
    %cst_7 = arith.constant 3.125000e-02 : f32
    %11 = vector.broadcast %cst_7 : f32 to vector<1x128xf32>
    %12 = arith.mulf %7, %11 : vector<1x128xf32>
    %cst_8 = arith.constant 3.125000e-02 : f32
    %13 = vector.broadcast %cst_8 : f32 to vector<1x128xf32>
    %14 = arith.mulf %10, %13 : vector<1x128xf32>
    %15 = arith.mulf %12, %12 : vector<1x128xf32>
    %16 = arith.subf %14, %15 : vector<1x128xf32>
    %cst_9 = arith.constant 0.000000e+00 : f32
    %17 = vector.broadcast %cst_9 : f32 to vector<1x128xf32>
    %18 = arith.maximumf %16, %17 : vector<1x128xf32>
    %cst_10 = arith.constant 9.99999974E-6 : f32
    %19 = vector.broadcast %cst_10 : f32 to vector<1x128xf32>
    %20 = arith.addf %18, %19 : vector<1x128xf32>
    %21 = math.rsqrt %20 : vector<1x128xf32>
    %c0_11 = arith.constant 0 : index
    %c0_12 = arith.constant 0 : index
    %22 = vector.load %arg4[%c0_11, %c0_12] : memref<1x128xf32, #tpu.memory_space<vmem>>, vector<1x128xf32>
    %23 = arith.mulf %22, %21 : vector<1x128xf32>
    %c0_13 = arith.constant 0 : index
    %c0_14 = arith.constant 0 : index
    %24 = vector.load %arg5[%c0_13, %c0_14] : memref<1x128xf32, #tpu.memory_space<vmem>>, vector<1x128xf32>
    %25 = arith.mulf %12, %23 : vector<1x128xf32>
    %26 = arith.subf %24, %25 : vector<1x128xf32>
    %27 = vector.broadcast %23 : vector<1x128xf32> to vector<32x128xf32>
    %28 = arith.mulf %5, %27 : vector<32x128xf32>
    %29 = vector.broadcast %26 : vector<1x128xf32> to vector<32x128xf32>
    %30 = arith.addf %28, %29 : vector<32x128xf32>
    %cst_15 = arith.constant 0.000000e+00 : f32
    %31 = vector.broadcast %cst_15 : f32 to vector<32x128xf32>
    %32 = arith.cmpf oge, %30, %31 : vector<32x128xf32>
    %cst_16 = arith.constant 2.000000e-01 : f32
    %33 = vector.broadcast %cst_16 : f32 to vector<32x128xf32>
    %34 = arith.mulf %33, %30 : vector<32x128xf32>
    %35 = arith.select %32, %30, %34 : vector<32x128xi1>, vector<32x128xf32>
    %c0_17 = arith.constant 0 : index
    %c0_18 = arith.constant 0 : index
    %36 = vector.load %arg6[%c0_17, %c0_18] : memref<32x128xf32, #tpu.memory_space<vmem>>, vector<32x128xf32>
    tpu.vector_store %arg6[%c0_17, %c0_18], %35 {strides = array<i32>} : memref<32x128xf32, #tpu.memory_space<vmem>>, vector<32x128xf32>,
    return
  }
  func.func @transform_0(%arg0: i32) -> (i32, i32) {
    %c0_i32 = arith.constant 0 : i32
    %c0_i32_0 = arith.constant 0 : i32
    %c0_i32_1 = arith.constant 0 : i32
    return %c0_i32, %c0_i32_0 : i32, i32
  }
  func.func @transform_1(%arg0: i32) -> (i32, i32) {
    %c0_i32 = arith.constant 0 : i32
    %c0_i32_0 = arith.constant 0 : i32
    %c0_i32_1 = arith.constant 0 : i32
    return %c0_i32, %c0_i32_0 : i32, i32
  }
  func.func @transform_2(%arg0: i32) -> (i32, i32) {
    %c0_i32 = arith.constant 0 : i32
    %c0_i32_0 = arith.constant 0 : i32
    %c0_i32_1 = arith.constant 0 : i32
    return %c0_i32, %c0_i32_0 : i32, i32
  }
  func.func @transform_3(%arg0: i32) -> (i32, i32) {
    %c0_i32 = arith.constant 0 : i32
    %c0_i32_0 = arith.constant 0 : i32
    %c0_i32_1 = arith.constant 0 : i32
    return %c0_i32, %c0_i32_0 : i32, i32
  }
  func.func @transform_4(%arg0: i32) -> (i32, i32) {
    %c0_i32 = arith.constant 0 : i32
    %c0_i32_0 = arith.constant 0 : i32
    %c0_i32_1 = arith.constant 0 : i32
    return %c0_i32, %c0_i32_0 : i32, i32
  }
  func.func @transform_5(%arg0: i32) -> (i32, i32) {
    %c0_i32 = arith.constant 0 : i32
    %c0_i32_0 = arith.constant 0 : i32
    %c0_i32_1 = arith.constant 0 : i32
    return %c0_i32, %c0_i32_0 : i32, i32
  }
}

</mosaic_0001>

<bundles_post_ra>
// kernel: _lambda_.4
= control target key start
LH: loop header
LB: loop body
LE: loop exit
PB: predicated region body
PF: predicated region fallthrough
CT: control target
= control target key end

     0   :  { %s1509_s1 = inlined_call_operand.vmem [shape: bf16[128,128], index: 1, kind: input, shape index: {}]   ;;  %s1510_s0 = inlined_call_operand.vmem [shape: bf16[512,128], index: 0, kind: input, shape index: {}]   ;;  %s1511_s2 = inlined_call_operand.vmem [shape: f32[1,128], index: 2, kind: input, shape index: {}]   ;;  %s1512_s3 = inlined_call_operand.vmem [shape: f32[512,128], index: 3, kind: output, shape index: {}]  }
   0x1   :  { %v1068_v0 = vld [vmem:[%s1509_s1] sm:$0xff]   ;;  %v1069_v1 = vld [vmem:[%s1509_s1 + $0x8] sm:$0xff]   ;;  %v1070_v2 = vld [vmem:[%s1509_s1 + $0x10] sm:$0xff]  }
   0x2   :  { %972 = vmatprep.subr.bf16.mxu0 %v1068_v0  ;;  %1052 = vmatprep.subr.bf16.mxu1 %v1068_v0  ;;  %v1071_v3 = vld [vmem:[%s1509_s1 + $0x18] sm:$0xff]   ;;  %v1076_v4 = vld [vmem:[%s1510_s0] sm:$0xff]   ;;  %v1073_v7 = vld [vmem:[%s1509_s1 + $0x28] sm:$0xff]  }
   0x3   :  { %973 = vmatpush3.bf16.msra.mxu0 %v1068_v0  ;;  %1060 = vmatpush3.bf16.msra.mxu1 %v1068_v0  ;;  %v1077_v5 = vld [vmem:[%s1510_s0 + $0x80] sm:$0xff]   ;;  %v1074_v8 = vld [vmem:[%s1509_s1 + $0x30] sm:$0xff]   ;;  %v1075_v9 = vld [vmem:[%s1509_s1 + $0x38] sm:$0xff]  }
   0x4   :  { %974 = vmatprep.subr.bf16.mxu0 %v1069_v1  ;;  %1053 = vmatprep.subr.bf16.mxu1 %v1069_v1  ;;  %v1072_v6 = vld [vmem:[%s1509_s1 + $0x20] sm:$0xff]   ;;  %v1078_v10 = vld [vmem:[%s1510_s0 + $0x8] sm:$0xff]   ;;  %v1080_v12 = vld [vmem:[%s1510_s0 + $0x10] sm:$0xff]  }
   0x5   :  { %988 = vmatprep.mubr.bf16.mxu0 %v1076_v4  ;;  %1020 = vmatprep.mubr.bf16.mxu1 %v1077_v5  ;;  %v1079_v11 = vld [vmem:[%s1510_s0 + $0x88] sm:$0xff]   ;;  %v1081_v13 = vld [vmem:[%s1510_s0 + $0x90] sm:$0xff]   ;;  %v1082_v14 = vld [vmem:[%s1510_s0 + $0x18] sm:$0xff]  }
   0x6   :  { %v1083_v15 = vld [vmem:[%s1510_s0 + $0x98] sm:$0xff]   ;;  %v1084_v16 = vld [vmem:[%s1510_s0 + $0x20] sm:$0xff]   ;;  %v1086_v18 = vld [vmem:[%s1510_s0 + $0x28] sm:$0xff]  }
   0x7   :  { %975 = vmatpush3.bf16.msra.mxu0 %v1069_v1  ;;  %1061 = vmatpush3.bf16.msra.mxu1 %v1069_v1  ;;  %v1085_v17 = vld [vmem:[%s1510_s0 + $0xa0] sm:$0xff]   ;;  %v1087_v19 = vld [vmem:[%s1510_s0 + $0xa8] sm:$0xff]   ;;  %v1088_v20 = vld [vmem:[%s1510_s0 + $0x30] sm:$0xff]  }
   0x8   :  { %976 = vmatprep.subr.bf16.mxu0 %v1070_v2  ;;  %1054 = vmatprep.subr.bf16.mxu1 %v1070_v2  ;;  %v1089_v21 = vld [vmem:[%s1510_s0 + $0xb0] sm:$0xff]   ;;  %v1090_v22 = vld [vmem:[%s1510_s0 + $0x38] sm:$0xff]   ;;  %v1092_v24 = vld [vmem:[%s1510_s0 + $0x40] sm:$0xff]  }
   0x9   :  { %v1091_v23 = vld [vmem:[%s1510_s0 + $0xb8] sm:$0xff]   ;;  %v1093_v25 = vld [vmem:[%s1510_s0 + $0xc0] sm:$0xff]   ;;  %v1094_v26 = vld [vmem:[%s1510_s0 + $0x48] sm:$0xff]  }
   0xa   :  { %v1095_v27 = vld [vmem:[%s1510_s0 + $0xc8] sm:$0xff]   ;;  %v1096_v28 = vld [vmem:[%s1510_s0 + $0x50] sm:$0xff]   ;;  %v1098_v30 = vld [vmem:[%s1510_s0 + $0x58] sm:$0xff]  }
   0xb   :  { %977 = vmatpush3.bf16.msra.mxu0 %v1070_v2  ;;  %1062 = vmatpush3.bf16.msra.mxu1 %v1070_v2  ;;  %v1097_v29 = vld [vmem:[%s1510_s0 + $0xd0] sm:$0xff]   ;;  %v1099_v31 = vld [vmem:[%s1510_s0 + $0xd8] sm:$0xff]   ;;  %v1100_v32 = vld [vmem:[%s1510_s0 + $0x60] sm:$0xff]  }
   0xc   :  { %978 = vmatprep.subr.bf16.mxu0 %v1071_v3  ;;  %1055 = vmatprep.subr.bf16.mxu1 %v1071_v3  ;;  %v1101_v33 = vld [vmem:[%s1510_s0 + $0xe0] sm:$0xff]   ;;  %v1102_v34 = vld [vmem:[%s1510_s0 + $0x68] sm:$0xff]   ;;  %v1104_v36 = vld [vmem:[%s1510_s0 + $0x70] sm:$0xff]  }
   0xd   :  { %v1103_v35 = vld [vmem:[%s1510_s0 + $0xe8] sm:$0xff]   ;;  %v1105_v37 = vld [vmem:[%s1510_s0 + $0xf0] sm:$0xff]   ;;  %v1106_v38 = vld [vmem:[%s1510_s0 + $0x78] sm:$0xff]  }
   0xe   :  { %v1107_v39 = vld [vmem:[%s1510_s0 + $0xf8] sm:$0xff]   ;;  %v1251_v40 = vld [vmem:[%s1511_s2] ss:$0 sm:$0xff] }
   0xf   :  { %979 = vmatpush3.bf16.msra.mxu0 %v1071_v3  ;;  %1063 = vmatpush3.bf16.msra.mxu1 %v1071_v3 }
  0x10   :  { %980 = vmatprep.subr.bf16.mxu0 %v1072_v6  ;;  %1056 = vmatprep.subr.bf16.mxu1 %v1072_v6 }
  0x13   :  { %981 = vmatpush3.bf16.msra.mxu0 %v1072_v6  ;;  %1064 = vmatpush3.bf16.msra.mxu1 %v1072_v6 }
  0x14   :  { %982 = vmatprep.subr.bf16.mxu0 %v1073_v7  ;;  %1057 = vmatprep.subr.bf16.mxu1 %v1073_v7 }
  0x17   :  { %983 = vmatpush3.bf16.msra.mxu0 %v1073_v7  ;;  %1065 = vmatpush3.bf16.msra.mxu1 %v1073_v7 }
  0x18   :  { %984 = vmatprep.subr.bf16.mxu0 %v1074_v8  ;;  %1058 = vmatprep.subr.bf16.mxu1 %v1074_v8 }
  0x1b   :  { %985 = vmatpush3.bf16.msra.mxu0 %v1074_v8  ;;  %1066 = vmatpush3.bf16.msra.mxu1 %v1074_v8 }
  0x1c   :  { %986 = vmatprep.subr.bf16.mxu0 %v1075_v9  ;;  %1059 = vmatprep.subr.bf16.mxu1 %v1075_v9 }
  0x1f   :  { %987 = vmatpush3.bf16.msra.mxu0 %v1075_v9  ;;  %1067 = vmatpush3.bf16.msra.mxu1 %v1075_v9 }
  0x22   :  { %989 = vmatmul.mubr.bf16.vlgmr.msra.gmra.mrb[0].mxu0 %v1078_v10  ;;  %1021 = vmatmul.mubr.bf16.vlgmr.msra.gmra.mrb[0].mxu1 %v1079_v11 }
  0x23   :  { %992 = vmatprep.mubr.bf16.mxu0 %v1080_v12  ;;  %1024 = vmatprep.mubr.bf16.mxu1 %v1081_v13 }
  0x2a   :  { %993 = vmatmul.mubr.bf16.gmra.mrb[4].mxu0 %v1082_v14  ;;  %1025 = vmatmul.mubr.bf16.gmra.mrb[4].mxu1 %v1083_v15 }
  0x2b   :  { %996 = vmatprep.mubr.bf16.mxu0 %v1084_v16  ;;  %1028 = vmatprep.mubr.bf16.mxu1 %v1085_v17 }
  0x32   :  { %997 = vmatmul.mubr.bf16.gmra.mrb[8].mxu0 %v1086_v18  ;;  %1029 = vmatmul.mubr.bf16.gmra.mrb[8].mxu1 %v1087_v19 }
  0x33   :  { %1000 = vmatprep.mubr.bf16.mxu0 %v1088_v20  ;;  %1032 = vmatprep.mubr.bf16.mxu1 %v1089_v21 }
  0x3a   :  { %1001 = vmatmul.mubr.bf16.gmra.mrb[12].mxu0 %v1090_v22  ;;  %1033 = vmatmul.mubr.bf16.gmra.mrb[12].mxu1 %v1091_v23 }
  0x3b   :  { %1004 = vmatprep.mubr.bf16.mxu0 %v1092_v24  ;;  %1036 = vmatprep.mubr.bf16.mxu1 %v1093_v25 }
  0x42   :  { %1005 = vmatmul.mubr.bf16.gmra.mrb[16].mxu0 %v1094_v26  ;;  %1037 = vmatmul.mubr.bf16.gmra.mrb[16].mxu1 %v1095_v27 }
  0x43   :  { %1008 = vmatprep.mubr.bf16.mxu0 %v1096_v28  ;;  %1040 = vmatprep.mubr.bf16.mxu1 %v1097_v29 }
  0x4a   :  { %1009 = vmatmul.mubr.bf16.gmra.mrb[20].mxu0 %v1098_v30  ;;  %1041 = vmatmul.mubr.bf16.gmra.mrb[20].mxu1 %v1099_v31 }
  0x4b   :  { %1012 = vmatprep.mubr.bf16.mxu0 %v1100_v32  ;;  %1044 = vmatprep.mubr.bf16.mxu1 %v1101_v33 }
  0x52   :  { %1013 = vmatmul.mubr.bf16.gmra.mrb[24].mxu0 %v1102_v34  ;;  %1045 = vmatmul.mubr.bf16.gmra.mrb[24].mxu1 %v1103_v35 }
  0x53   :  { %1016 = vmatprep.mubr.bf16.mxu0 %v1104_v36  ;;  %1048 = vmatprep.mubr.bf16.mxu1 %v1105_v37 }
  0x5a   :  { %1017 = vmatmul.mubr.bf16.gmra.mrb[28].mxu0 %v1106_v38  ;;  %1049 = vmatmul.mubr.bf16.gmra.mrb[28].mxu1 %v1107_v39 }
  0xf5   :  { %v990_v41 = vpop.f32.mrb[0].mxu0  ;;  %v1022_v42 = vpop.f32.mrb[0].mxu1 }
  0xf6   :  { %v385_v43 = vadd.f32 %v990_v41, %v1251_v40  ;;  %v513_v44 = vadd.f32 %v1022_v42, %v1251_v40  ;;  %v376_v45 = vpop.f32.mrb[1].mxu0  ;;  %v504_v46 = vpop.f32.mrb[1].mxu1 }
  0xf7   :  { %v377_v47 = vadd.f32 %v1251_v40, %v376_v45  ;;  %v505_v48 = vadd.f32 %v1251_v40, %v504_v46  ;;  %v991_v49 = vpop.f32.mrb[2].mxu0  ;;  %v1023_v50 = vpop.f32.mrb[2].mxu1 }
  0xf8   :  { %vm633_vm0 = vcmp.ge.f32.partialorder %v385_v43, 0.0  ;;  %v697_v51 = vmul.f32 0.2, %v385_v43  ;;  %vm665_vm1 = vcmp.ge.f32.partialorder %v513_v44, 0.0  ;;  %v729_v52 = vmul.f32 0.2, %v513_v44 }
  0xf9   :  { %vm631_vm2 = vcmp.ge.f32.partialorder %v377_v47, 0.0  ;;  %v695_v53 = vmul.f32 0.2, %v377_v47  ;;  %vm663_vm3 = vcmp.ge.f32.partialorder %v505_v48, 0.0  ;;  %v727_v54 = vmul.f32 0.2, %v505_v48 }
  0xfa   :  { %v761_v55 = vsel %vm633_vm0, %v385_v43, %v697_v51  ;;  %v793_v56 = vsel %vm665_vm1, %v513_v44, %v729_v52  ;;  %v388_v57 = vadd.f32 %v991_v49, %v1251_v40  ;;  %v516_v58 = vadd.f32 %v1023_v50, %v1251_v40  ;;  %v379_v59 = vpop.f32.mrb[3].mxu0  ;;  %v507_v60 = vpop.f32.mrb[3].mxu1 }
  0xfb   :  { %825 = vst [vmem:[%s1512_s3 + $0x10] sm:$0xff] %v761_v55  ;;  %857 = vst [vmem:[%s1512_s3 + $0x110] sm:$0xff] %v793_v56  ;;  %v759_v61 = vsel %vm631_vm2, %v377_v47, %v695_v53  ;;  %v791_v62 = vsel %vm663_vm3, %v505_v48, %v727_v54  ;;  %v380_v63 = vadd.f32 %v1251_v40, %v379_v59 }
  0xfc   :  { %v508_v0 = vadd.f32 %v1251_v40, %v507_v60  ;;  %823 = vst [vmem:[%s1512_s3] sm:$0xff] %v759_v61  ;;  %855 = vst [vmem:[%s1512_s3 + $0x100] sm:$0xff] %v791_v62  ;;  %vm634_vm4 = vcmp.ge.f32.partialorder %v388_v57, 0.0  ;;  %v698_v1 = vmul.f32 0.2, %v388_v57  ;;  %vm666_vm5 = vcmp.ge.f32.partialorder %v516_v58, 0.0 }
  0xfd   :  { %v730_v2 = vmul.f32 0.2, %v516_v58  ;;  %vm632_vm6 = vcmp.ge.f32.partialorder %v380_v63, 0.0  ;;  %v696_v3 = vmul.f32 0.2, %v380_v63  ;;  %v994_v7 = vpop.f32.mrb[4].mxu0 }
  0xfe   :  { %vm664_vm7 = vcmp.ge.f32.partialorder %v508_v0, 0.0  ;;  %v728_v4 = vmul.f32 0.2, %v508_v0  ;;  %v762_v5 = vsel %vm634_vm4, %v388_v57, %v698_v1  ;;  %v1026_v8 = vpop.f32.mrb[4].mxu1  ;;  %v401_v11 = vadd.f32 %v994_v7, %v1251_v40  ;;  %v392_v13 = vpop.f32.mrb[5].mxu0 }
  0xff   :  { %v794_v6 = vsel %vm666_vm5, %v516_v58, %v730_v2  ;;  %826 = vst [vmem:[%s1512_s3 + $0x18] sm:$0xff] %v762_v5  ;;  %v760_v9 = vsel %vm632_vm6, %v380_v63, %v696_v3  ;;  %v529_v12 = vadd.f32 %v1026_v8, %v1251_v40  ;;  %v520_v14 = vpop.f32.mrb[5].mxu1  ;;  %v393_v15 = vadd.f32 %v1251_v40, %v392_v13  ;;  %v995_v17 = vpop.f32.mrb[6].mxu0 }
 0x100   :  { %858 = vst [vmem:[%s1512_s3 + $0x118] sm:$0xff] %v794_v6  ;;  %v792_v10 = vsel %vm664_vm7, %v508_v0, %v728_v4  ;;  %824 = vst [vmem:[%s1512_s3 + $0x8] sm:$0xff] %v760_v9  ;;  %v521_v16 = vadd.f32 %v1251_v40, %v520_v14  ;;  %v1027_v18 = vpop.f32.mrb[6].mxu1  ;;  %vm637_vm8 = vcmp.ge.f32.partialorder %v401_v11, 0.0  ;;  %v701_v19 = vmul.f32 0.2, %v401_v11 }
 0x101   :  { %856 = vst [vmem:[%s1512_s3 + $0x108] sm:$0xff] %v792_v10  ;;  %vm669_vm9 = vcmp.ge.f32.partialorder %v529_v12, 0.0  ;;  %v733_v20 = vmul.f32 0.2, %v529_v12  ;;  %vm635_vm10 = vcmp.ge.f32.partialorder %v393_v15, 0.0  ;;  %v404_v25 = vadd.f32 %v995_v17, %v1251_v40  ;;  %v395_v27 = vpop.f32.mrb[7].mxu0 }
 0x102   :  { %v699_v21 = vmul.f32 0.2, %v393_v15  ;;  %vm667_vm11 = vcmp.ge.f32.partialorder %v521_v16, 0.0  ;;  %v731_v22 = vmul.f32 0.2, %v521_v16  ;;  %v765_v23 = vsel %vm637_vm8, %v401_v11, %v701_v19  ;;  %v523_v28 = vpop.f32.mrb[7].mxu1 }
 0x103   :  { %v797_v24 = vsel %vm669_vm9, %v529_v12, %v733_v20  ;;  %v532_v26 = vadd.f32 %v1027_v18, %v1251_v40  ;;  %829 = vst [vmem:[%s1512_s3 + $0x30] sm:$0xff] %v765_v23  ;;  %v396_v31 = vadd.f32 %v1251_v40, %v395_v27  ;;  %v524_v32 = vadd.f32 %v1251_v40, %v523_v28 }
 0x104   :  { %861 = vst [vmem:[%s1512_s3 + $0x130] sm:$0xff] %v797_v24  ;;  %v763_v29 = vsel %vm635_vm10, %v393_v15, %v699_v21  ;;  %v795_v30 = vsel %vm667_vm11, %v521_v16, %v731_v22  ;;  %vm638_vm12 = vcmp.ge.f32.partialorder %v404_v25, 0.0  ;;  %v702_v33 = vmul.f32 0.2, %v404_v25 }
 0x105   :  { %827 = vst [vmem:[%s1512_s3 + $0x20] sm:$0xff] %v763_v29  ;;  %859 = vst [vmem:[%s1512_s3 + $0x120] sm:$0xff] %v795_v30  ;;  %vm670_vm13 = vcmp.ge.f32.partialorder %v532_v26, 0.0  ;;  %v734_v34 = vmul.f32 0.2, %v532_v26  ;;  %vm636_vm14 = vcmp.ge.f32.partialorder %v396_v31, 0.0 }
 0x106   :  { %v700_v35 = vmul.f32 0.2, %v396_v31  ;;  %vm668_vm15 = vcmp.ge.f32.partialorder %v524_v32, 0.0  ;;  %v732_v36 = vmul.f32 0.2, %v524_v32  ;;  %v766_v37 = vsel %vm638_vm12, %v404_v25, %v702_v33  ;;  %v998_v39 = vpop.f32.mrb[8].mxu0 }
 0x107   :  { %v798_v38 = vsel %vm670_vm13, %v532_v26, %v734_v34  ;;  %v1030_v41 = vpop.f32.mrb[8].mxu1  ;;  %830 = vst [vmem:[%s1512_s3 + $0x38] sm:$0xff] %v766_v37  ;;  %v417_v44 = vadd.f32 %v998_v39, %v1251_v40  ;;  %v408_v46 = vpop.f32.mrb[9].mxu0 }
 0x108   :  { %862 = vst [vmem:[%s1512_s3 + $0x138] sm:$0xff] %v798_v38  ;;  %v764_v42 = vsel %vm636_vm14, %v396_v31, %v700_v35  ;;  %v796_v43 = vsel %vm668_vm15, %v524_v32, %v732_v36  ;;  %v545_v45 = vadd.f32 %v1030_v41, %v1251_v40  ;;  %v536_v47 = vpop.f32.mrb[9].mxu1  ;;  %v409_v48 = vadd.f32 %v1251_v40, %v408_v46  ;;  %v999_v50 = vpop.f32.mrb[10].mxu0 }
 0x109   :  { %828 = vst [vmem:[%s1512_s3 + $0x28] sm:$0xff] %v764_v42  ;;  %860 = vst [vmem:[%s1512_s3 + $0x128] sm:$0xff] %v796_v43  ;;  %v537_v49 = vadd.f32 %v1251_v40, %v536_v47  ;;  %v1031_v51 = vpop.f32.mrb[10].mxu1  ;;  %vm641_vm0 = vcmp.ge.f32.partialorder %v417_v44, 0.0  ;;  %v705_v52 = vmul.f32 0.2, %v417_v44  ;;  %v420_v58 = vadd.f32 %v999_v50, %v1251_v40 }
 0x10a   :  { %vm673_vm1 = vcmp.ge.f32.partialorder %v545_v45, 0.0  ;;  %v737_v53 = vmul.f32 0.2, %v545_v45  ;;  %vm639_vm2 = vcmp.ge.f32.partialorder %v409_v48, 0.0  ;;  %v703_v54 = vmul.f32 0.2, %v409_v48 }
 0x10b   :  { %vm671_vm3 = vcmp.ge.f32.partialorder %v537_v49, 0.0  ;;  %v735_v55 = vmul.f32 0.2, %v537_v49  ;;  %v769_v56 = vsel %vm641_vm0, %v417_v44, %v705_v52  ;;  %v548_v59 = vadd.f32 %v1031_v51, %v1251_v40  ;;  %v411_v60 = vpop.f32.mrb[11].mxu0  ;;  %v539_v61 = vpop.f32.mrb[11].mxu1 }
 0x10c   :  { %v801_v57 = vsel %vm673_vm1, %v545_v45, %v737_v53  ;;  %833 = vst [vmem:[%s1512_s3 + $0x50] sm:$0xff] %v769_v56  ;;  %v767_v62 = vsel %vm639_vm2, %v409_v48, %v703_v54  ;;  %v412_v0 = vadd.f32 %v1251_v40, %v411_v60  ;;  %v540_v1 = vadd.f32 %v1251_v40, %v539_v61 }
 0x10d   :  { %865 = vst [vmem:[%s1512_s3 + $0x150] sm:$0xff] %v801_v57  ;;  %v799_v63 = vsel %vm671_vm3, %v537_v49, %v735_v55  ;;  %v1002_v2 = vpop.f32.mrb[12].mxu0  ;;  %v1034_v3 = vpop.f32.mrb[12].mxu1  ;;  %831 = vst [vmem:[%s1512_s3 + $0x40] sm:$0xff] %v767_v62  ;;  %vm642_vm4 = vcmp.ge.f32.partialorder %v420_v58, 0.0  ;;  %vm674_vm5 = vcmp.ge.f32.partialorder %v548_v59, 0.0 }
 0x10e   :  { %863 = vst [vmem:[%s1512_s3 + $0x140] sm:$0xff] %v799_v63  ;;  %v706_v4 = vmul.f32 0.2, %v420_v58  ;;  %v738_v5 = vmul.f32 0.2, %v548_v59  ;;  %vm640_vm6 = vcmp.ge.f32.partialorder %v412_v0, 0.0  ;;  %v433_v10 = vadd.f32 %v1002_v2, %v1251_v40 }
 0x10f   :  { %v704_v6 = vmul.f32 0.2, %v412_v0  ;;  %vm672_vm7 = vcmp.ge.f32.partialorder %v540_v1, 0.0  ;;  %v736_v7 = vmul.f32 0.2, %v540_v1  ;;  %v561_v11 = vadd.f32 %v1034_v3, %v1251_v40  ;;  %v424_v12 = vpop.f32.mrb[13].mxu0 }
 0x110   :  { %v770_v8 = vsel %vm642_vm4, %v420_v58, %v706_v4  ;;  %v802_v9 = vsel %vm674_vm5, %v548_v59, %v738_v5  ;;  %v552_v13 = vpop.f32.mrb[13].mxu1  ;;  %v425_v16 = vadd.f32 %v1251_v40, %v424_v12  ;;  %v1003_v18 = vpop.f32.mrb[14].mxu0  ;;  %vm645_vm8 = vcmp.ge.f32.partialorder %v433_v10, 0.0 }
 0x111   :  { %834 = vst [vmem:[%s1512_s3 + $0x58] sm:$0xff] %v770_v8  ;;  %866 = vst [vmem:[%s1512_s3 + $0x158] sm:$0xff] %v802_v9  ;;  %v768_v14 = vsel %vm640_vm6, %v412_v0, %v704_v6  ;;  %v800_v15 = vsel %vm672_vm7, %v540_v1, %v736_v7  ;;  %v553_v17 = vadd.f32 %v1251_v40, %v552_v13  ;;  %v1035_v19 = vpop.f32.mrb[14].mxu1  ;;  %v709_v20 = vmul.f32 0.2, %v433_v10  ;;  %v427_v28 = vpop.f32.mrb[15].mxu0 }
 0x112   :  { %832 = vst [vmem:[%s1512_s3 + $0x48] sm:$0xff] %v768_v14  ;;  %864 = vst [vmem:[%s1512_s3 + $0x148] sm:$0xff] %v800_v15  ;;  %vm677_vm9 = vcmp.ge.f32.partialorder %v561_v11, 0.0  ;;  %v741_v21 = vmul.f32 0.2, %v561_v11  ;;  %vm643_vm10 = vcmp.ge.f32.partialorder %v425_v16, 0.0  ;;  %v436_v26 = vadd.f32 %v1003_v18, %v1251_v40 }
 0x113   :  { %v707_v22 = vmul.f32 0.2, %v425_v16  ;;  %vm675_vm11 = vcmp.ge.f32.partialorder %v553_v17, 0.0  ;;  %v739_v23 = vmul.f32 0.2, %v553_v17  ;;  %v773_v24 = vsel %vm645_vm8, %v433_v10, %v709_v20  ;;  %v555_v29 = vpop.f32.mrb[15].mxu1 }
 0x114   :  { %v805_v25 = vsel %vm677_vm9, %v561_v11, %v741_v21  ;;  %v564_v27 = vadd.f32 %v1035_v19, %v1251_v40  ;;  %837 = vst [vmem:[%s1512_s3 + $0x70] sm:$0xff] %v773_v24  ;;  %v428_v32 = vadd.f32 %v1251_v40, %v427_v28  ;;  %v556_v33 = vadd.f32 %v1251_v40, %v555_v29 }
 0x115   :  { %869 = vst [vmem:[%s1512_s3 + $0x170] sm:$0xff] %v805_v25  ;;  %v771_v30 = vsel %vm643_vm10, %v425_v16, %v707_v22  ;;  %v803_v31 = vsel %vm675_vm11, %v553_v17, %v739_v23  ;;  %v1006_v34 = vpop.f32.mrb[16].mxu0  ;;  %v1038_v35 = vpop.f32.mrb[16].mxu1  ;;  %vm646_vm12 = vcmp.ge.f32.partialorder %v436_v26, 0.0  ;;  %v710_v36 = vmul.f32 0.2, %v436_v26 }
 0x116   :  { %835 = vst [vmem:[%s1512_s3 + $0x60] sm:$0xff] %v771_v30  ;;  %867 = vst [vmem:[%s1512_s3 + $0x160] sm:$0xff] %v803_v31  ;;  %vm678_vm13 = vcmp.ge.f32.partialorder %v564_v27, 0.0  ;;  %v742_v37 = vmul.f32 0.2, %v564_v27  ;;  %vm644_vm14 = vcmp.ge.f32.partialorder %v428_v32, 0.0  ;;  %v449_v43 = vadd.f32 %v1006_v34, %v1251_v40 }
 0x117   :  { %v708_v38 = vmul.f32 0.2, %v428_v32  ;;  %vm676_vm15 = vcmp.ge.f32.partialorder %v556_v33, 0.0  ;;  %v740_v39 = vmul.f32 0.2, %v556_v33  ;;  %v774_v41 = vsel %vm646_vm12, %v436_v26, %v710_v36  ;;  %v440_v45 = vpop.f32.mrb[17].mxu0 }
 0x118   :  { %v806_v42 = vsel %vm678_vm13, %v564_v27, %v742_v37  ;;  %v577_v44 = vadd.f32 %v1038_v35, %v1251_v40  ;;  %v568_v46 = vpop.f32.mrb[17].mxu1  ;;  %838 = vst [vmem:[%s1512_s3 + $0x78] sm:$0xff] %v774_v41  ;;  %v441_v49 = vadd.f32 %v1251_v40, %v440_v45  ;;  %v1007_v51 = vpop.f32.mrb[18].mxu0  ;;  %vm649_vm0 = vcmp.ge.f32.partialorder %v449_v43, 0.0 }
 0x119   :  { %870 = vst [vmem:[%s1512_s3 + $0x178] sm:$0xff] %v806_v42  ;;  %v772_v47 = vsel %vm644_vm14, %v428_v32, %v708_v38  ;;  %v804_v48 = vsel %vm676_vm15, %v556_v33, %v740_v39  ;;  %v569_v50 = vadd.f32 %v1251_v40, %v568_v46  ;;  %v1039_v52 = vpop.f32.mrb[18].mxu1  ;;  %v713_v53 = vmul.f32 0.2, %v449_v43  ;;  %v443_v61 = vpop.f32.mrb[19].mxu0 }
 0x11a   :  { %836 = vst [vmem:[%s1512_s3 + $0x68] sm:$0xff] %v772_v47  ;;  %868 = vst [vmem:[%s1512_s3 + $0x168] sm:$0xff] %v804_v48  ;;  %vm681_vm1 = vcmp.ge.f32.partialorder %v577_v44, 0.0  ;;  %v745_v54 = vmul.f32 0.2, %v577_v44  ;;  %vm647_vm2 = vcmp.ge.f32.partialorder %v441_v49, 0.0  ;;  %v452_v59 = vadd.f32 %v1007_v51, %v1251_v40 }
 0x11b   :  { %v711_v55 = vmul.f32 0.2, %v441_v49  ;;  %vm679_vm3 = vcmp.ge.f32.partialorder %v569_v50, 0.0  ;;  %v743_v56 = vmul.f32 0.2, %v569_v50  ;;  %v777_v57 = vsel %vm649_vm0, %v449_v43, %v713_v53  ;;  %v571_v62 = vpop.f32.mrb[19].mxu1 }
 0x11c   :  { %v809_v58 = vsel %vm681_vm1, %v577_v44, %v745_v54  ;;  %v580_v60 = vadd.f32 %v1039_v52, %v1251_v40  ;;  %841 = vst [vmem:[%s1512_s3 + $0x90] sm:$0xff] %v777_v57  ;;  %v444_v1 = vadd.f32 %v1251_v40, %v443_v61  ;;  %v572_v2 = vadd.f32 %v1251_v40, %v571_v62 }
 0x11d   :  { %873 = vst [vmem:[%s1512_s3 + $0x190] sm:$0xff] %v809_v58  ;;  %v775_v63 = vsel %vm647_vm2, %v441_v49, %v711_v55  ;;  %v807_v0 = vsel %vm679_vm3, %v569_v50, %v743_v56  ;;  %v1010_v3 = vpop.f32.mrb[20].mxu0  ;;  %v1042_v4 = vpop.f32.mrb[20].mxu1  ;;  %vm650_vm4 = vcmp.ge.f32.partialorder %v452_v59, 0.0  ;;  %v714_v5 = vmul.f32 0.2, %v452_v59 }
 0x11e   :  { %839 = vst [vmem:[%s1512_s3 + $0x80] sm:$0xff] %v775_v63  ;;  %871 = vst [vmem:[%s1512_s3 + $0x180] sm:$0xff] %v807_v0  ;;  %vm682_vm5 = vcmp.ge.f32.partialorder %v580_v60, 0.0  ;;  %v746_v6 = vmul.f32 0.2, %v580_v60  ;;  %vm648_vm6 = vcmp.ge.f32.partialorder %v444_v1, 0.0  ;;  %v465_v11 = vadd.f32 %v1010_v3, %v1251_v40 }
 0x11f   :  { %v712_v7 = vmul.f32 0.2, %v444_v1  ;;  %vm680_vm7 = vcmp.ge.f32.partialorder %v572_v2, 0.0  ;;  %v744_v8 = vmul.f32 0.2, %v572_v2  ;;  %v778_v9 = vsel %vm650_vm4, %v452_v59, %v714_v5  ;;  %v456_v13 = vpop.f32.mrb[21].mxu0 }
 0x120   :  { %v810_v10 = vsel %vm682_vm5, %v580_v60, %v746_v6  ;;  %v593_v12 = vadd.f32 %v1042_v4, %v1251_v40  ;;  %v584_v14 = vpop.f32.mrb[21].mxu1  ;;  %842 = vst [vmem:[%s1512_s3 + $0x98] sm:$0xff] %v778_v9  ;;  %v457_v17 = vadd.f32 %v1251_v40, %v456_v13  ;;  %v1011_v19 = vpop.f32.mrb[22].mxu0  ;;  %vm653_vm8 = vcmp.ge.f32.partialorder %v465_v11, 0.0 }
 0x121   :  { %874 = vst [vmem:[%s1512_s3 + $0x198] sm:$0xff] %v810_v10  ;;  %v776_v15 = vsel %vm648_vm6, %v444_v1, %v712_v7  ;;  %v808_v16 = vsel %vm680_vm7, %v572_v2, %v744_v8  ;;  %v585_v18 = vadd.f32 %v1251_v40, %v584_v14  ;;  %v1043_v20 = vpop.f32.mrb[22].mxu1  ;;  %v717_v21 = vmul.f32 0.2, %v465_v11  ;;  %v459_v29 = vpop.f32.mrb[23].mxu0 }
 0x122   :  { %840 = vst [vmem:[%s1512_s3 + $0x88] sm:$0xff] %v776_v15  ;;  %872 = vst [vmem:[%s1512_s3 + $0x188] sm:$0xff] %v808_v16  ;;  %vm685_vm9 = vcmp.ge.f32.partialorder %v593_v12, 0.0  ;;  %v749_v22 = vmul.f32 0.2, %v593_v12  ;;  %vm651_vm10 = vcmp.ge.f32.partialorder %v457_v17, 0.0  ;;  %v468_v27 = vadd.f32 %v1011_v19, %v1251_v40 }
 0x123   :  { %v715_v23 = vmul.f32 0.2, %v457_v17  ;;  %vm683_vm11 = vcmp.ge.f32.partialorder %v585_v18, 0.0  ;;  %v747_v24 = vmul.f32 0.2, %v585_v18  ;;  %v781_v25 = vsel %vm653_vm8, %v465_v11, %v717_v21  ;;  %v587_v30 = vpop.f32.mrb[23].mxu1 }
 0x124   :  { %v813_v26 = vsel %vm685_vm9, %v593_v12, %v749_v22  ;;  %v596_v28 = vadd.f32 %v1043_v20, %v1251_v40  ;;  %845 = vst [vmem:[%s1512_s3 + $0xb0] sm:$0xff] %v781_v25  ;;  %v460_v33 = vadd.f32 %v1251_v40, %v459_v29  ;;  %v588_v34 = vadd.f32 %v1251_v40, %v587_v30 }
 0x125   :  { %877 = vst [vmem:[%s1512_s3 + $0x1b0] sm:$0xff] %v813_v26  ;;  %v779_v31 = vsel %vm651_vm10, %v457_v17, %v715_v23  ;;  %v811_v32 = vsel %vm683_vm11, %v585_v18, %v747_v24  ;;  %v1014_v35 = vpop.f32.mrb[24].mxu0  ;;  %v1046_v36 = vpop.f32.mrb[24].mxu1  ;;  %vm654_vm12 = vcmp.ge.f32.partialorder %v468_v27, 0.0  ;;  %v718_v37 = vmul.f32 0.2, %v468_v27 }
 0x126   :  { %843 = vst [vmem:[%s1512_s3 + $0xa0] sm:$0xff] %v779_v31  ;;  %875 = vst [vmem:[%s1512_s3 + $0x1a0] sm:$0xff] %v811_v32  ;;  %vm686_vm13 = vcmp.ge.f32.partialorder %v596_v28, 0.0  ;;  %v750_v38 = vmul.f32 0.2, %v596_v28  ;;  %vm652_vm14 = vcmp.ge.f32.partialorder %v460_v33, 0.0  ;;  %v481_v44 = vadd.f32 %v1014_v35, %v1251_v40 }
 0x127   :  { %v716_v39 = vmul.f32 0.2, %v460_v33  ;;  %vm684_vm15 = vcmp.ge.f32.partialorder %v588_v34, 0.0  ;;  %v748_v41 = vmul.f32 0.2, %v588_v34  ;;  %v782_v42 = vsel %vm654_vm12, %v468_v27, %v718_v37  ;;  %v472_v46 = vpop.f32.mrb[25].mxu0 }
 0x128   :  { %v814_v43 = vsel %vm686_vm13, %v596_v28, %v750_v38  ;;  %v609_v45 = vadd.f32 %v1046_v36, %v1251_v40  ;;  %v600_v47 = vpop.f32.mrb[25].mxu1  ;;  %846 = vst [vmem:[%s1512_s3 + $0xb8] sm:$0xff] %v782_v42  ;;  %v473_v50 = vadd.f32 %v1251_v40, %v472_v46  ;;  %v1015_v52 = vpop.f32.mrb[26].mxu0  ;;  %vm657_vm0 = vcmp.ge.f32.partialorder %v481_v44, 0.0 }
 0x129   :  { %878 = vst [vmem:[%s1512_s3 + $0x1b8] sm:$0xff] %v814_v43  ;;  %v780_v48 = vsel %vm652_vm14, %v460_v33, %v716_v39  ;;  %v812_v49 = vsel %vm684_vm15, %v588_v34, %v748_v41  ;;  %v601_v51 = vadd.f32 %v1251_v40, %v600_v47  ;;  %v1047_v53 = vpop.f32.mrb[26].mxu1  ;;  %v721_v54 = vmul.f32 0.2, %v481_v44  ;;  %v475_v62 = vpop.f32.mrb[27].mxu0 }
 0x12a   :  { %844 = vst [vmem:[%s1512_s3 + $0xa8] sm:$0xff] %v780_v48  ;;  %876 = vst [vmem:[%s1512_s3 + $0x1a8] sm:$0xff] %v812_v49  ;;  %vm689_vm1 = vcmp.ge.f32.partialorder %v609_v45, 0.0  ;;  %v753_v55 = vmul.f32 0.2, %v609_v45  ;;  %vm655_vm2 = vcmp.ge.f32.partialorder %v473_v50, 0.0  ;;  %v484_v60 = vadd.f32 %v1015_v52, %v1251_v40 }
 0x12b   :  { %v719_v56 = vmul.f32 0.2, %v473_v50  ;;  %vm687_vm3 = vcmp.ge.f32.partialorder %v601_v51, 0.0  ;;  %v751_v57 = vmul.f32 0.2, %v601_v51  ;;  %v785_v58 = vsel %vm657_vm0, %v481_v44, %v721_v54  ;;  %v603_v63 = vpop.f32.mrb[27].mxu1 }
 0x12c   :  { %v817_v59 = vsel %vm689_vm1, %v609_v45, %v753_v55  ;;  %v612_v61 = vadd.f32 %v1047_v53, %v1251_v40  ;;  %849 = vst [vmem:[%s1512_s3 + $0xd0] sm:$0xff] %v785_v58  ;;  %v476_v2 = vadd.f32 %v1251_v40, %v475_v62  ;;  %v604_v3 = vadd.f32 %v1251_v40, %v603_v63 }
 0x12d   :  { %881 = vst [vmem:[%s1512_s3 + $0x1d0] sm:$0xff] %v817_v59  ;;  %v783_v0 = vsel %vm655_vm2, %v473_v50, %v719_v56  ;;  %v815_v1 = vsel %vm687_vm3, %v601_v51, %v751_v57  ;;  %v1018_v4 = vpop.f32.mrb[28].mxu0  ;;  %v1050_v5 = vpop.f32.mrb[28].mxu1  ;;  %vm658_vm4 = vcmp.ge.f32.partialorder %v484_v60, 0.0  ;;  %v722_v6 = vmul.f32 0.2, %v484_v60 }
 0x12e   :  { %847 = vst [vmem:[%s1512_s3 + $0xc0] sm:$0xff] %v783_v0  ;;  %879 = vst [vmem:[%s1512_s3 + $0x1c0] sm:$0xff] %v815_v1  ;;  %vm690_vm5 = vcmp.ge.f32.partialorder %v612_v61, 0.0  ;;  %v754_v7 = vmul.f32 0.2, %v612_v61  ;;  %vm656_vm6 = vcmp.ge.f32.partialorder %v476_v2, 0.0  ;;  %v497_v12 = vadd.f32 %v1018_v4, %v1251_v40 }
 0x12f   :  { %v720_v8 = vmul.f32 0.2, %v476_v2  ;;  %vm688_vm7 = vcmp.ge.f32.partialorder %v604_v3, 0.0  ;;  %v752_v9 = vmul.f32 0.2, %v604_v3  ;;  %v786_v10 = vsel %vm658_vm4, %v484_v60, %v722_v6  ;;  %v488_v14 = vpop.f32.mrb[29].mxu0 }
 0x130   :  { %v818_v11 = vsel %vm690_vm5, %v612_v61, %v754_v7  ;;  %v625_v13 = vadd.f32 %v1050_v5, %v1251_v40  ;;  %v616_v15 = vpop.f32.mrb[29].mxu1  ;;  %850 = vst [vmem:[%s1512_s3 + $0xd8] sm:$0xff] %v786_v10  ;;  %v489_v18 = vadd.f32 %v1251_v40, %v488_v14  ;;  %v1019_v20 = vpop.f32.mrb[30].mxu0  ;;  %vm661_vm8 = vcmp.ge.f32.partialorder %v497_v12, 0.0 }
 0x131   :  { %882 = vst [vmem:[%s1512_s3 + $0x1d8] sm:$0xff] %v818_v11  ;;  %v784_v16 = vsel %vm656_vm6, %v476_v2, %v720_v8  ;;  %v816_v17 = vsel %vm688_vm7, %v604_v3, %v752_v9  ;;  %v617_v19 = vadd.f32 %v1251_v40, %v616_v15  ;;  %v1051_v21 = vpop.f32.mrb[30].mxu1  ;;  %v725_v22 = vmul.f32 0.2, %v497_v12  ;;  %v491_v30 = vpop.f32.mrb[31].mxu0 }
 0x132   :  { %848 = vst [vmem:[%s1512_s3 + $0xc8] sm:$0xff] %v784_v16  ;;  %880 = vst [vmem:[%s1512_s3 + $0x1c8] sm:$0xff] %v816_v17  ;;  %vm693_vm9 = vcmp.ge.f32.partialorder %v625_v13, 0.0  ;;  %v757_v23 = vmul.f32 0.2, %v625_v13  ;;  %vm659_vm10 = vcmp.ge.f32.partialorder %v489_v18, 0.0  ;;  %v500_v28 = vadd.f32 %v1019_v20, %v1251_v40 }
 0x133   :  { %v723_v24 = vmul.f32 0.2, %v489_v18  ;;  %vm691_vm11 = vcmp.ge.f32.partialorder %v617_v19, 0.0  ;;  %v755_v25 = vmul.f32 0.2, %v617_v19  ;;  %v789_v26 = vsel %vm661_vm8, %v497_v12, %v725_v22  ;;  %v619_v31 = vpop.f32.mrb[31].mxu1 }
 0x134   :  { %v821_v27 = vsel %vm693_vm9, %v625_v13, %v757_v23  ;;  %v628_v29 = vadd.f32 %v1051_v21, %v1251_v40  ;;  %853 = vst [vmem:[%s1512_s3 + $0xf0] sm:$0xff] %v789_v26  ;;  %v492_v34 = vadd.f32 %v1251_v40, %v491_v30  ;;  %v620_v35 = vadd.f32 %v1251_v40, %v619_v31 }
 0x135   :  { %885 = vst [vmem:[%s1512_s3 + $0x1f0] sm:$0xff] %v821_v27  ;;  %v787_v32 = vsel %vm659_vm10, %v489_v18, %v723_v24  ;;  %v819_v33 = vsel %vm691_vm11, %v617_v19, %v755_v25  ;;  %vm662_vm12 = vcmp.ge.f32.partialorder %v500_v28, 0.0  ;;  %v726_v36 = vmul.f32 0.2, %v500_v28 }
 0x136   :  { %851 = vst [vmem:[%s1512_s3 + $0xe0] sm:$0xff] %v787_v32  ;;  %883 = vst [vmem:[%s1512_s3 + $0x1e0] sm:$0xff] %v819_v33  ;;  %vm694_vm13 = vcmp.ge.f32.partialorder %v628_v29, 0.0  ;;  %v758_v37 = vmul.f32 0.2, %v628_v29  ;;  %vm660_vm14 = vcmp.ge.f32.partialorder %v492_v34, 0.0 }
 0x137   :  { %v724_v38 = vmul.f32 0.2, %v492_v34  ;;  %vm692_vm15 = vcmp.ge.f32.partialorder %v620_v35, 0.0  ;;  %v756_v39 = vmul.f32 0.2, %v620_v35  ;;  %v790_v41 = vsel %vm662_vm12, %v500_v28, %v726_v36 }
 0x138   :  { %v822_v42 = vsel %vm694_vm13, %v628_v29, %v758_v37  ;;  %854 = vst [vmem:[%s1512_s3 + $0xf8] sm:$0xff] %v790_v41 }
 0x139   :  { %886 = vst [vmem:[%s1512_s3 + $0x1f8] sm:$0xff] %v822_v42  ;;  %v788_v40 = vsel %vm660_vm14, %v492_v34, %v724_v38  ;;  %v820_v43 = vsel %vm692_vm15, %v620_v35, %v756_v39 }
 0x13a   :  { %852 = vst [vmem:[%s1512_s3 + $0xe8] sm:$0xff] %v788_v40  ;;  %884 = vst [vmem:[%s1512_s3 + $0x1e8] sm:$0xff] %v820_v43 }

// kernel: _lambda_.5
= control target key start
LH: loop header
LB: loop body
LE: loop exit
PB: predicated region body
PF: predicated region fallthrough
CT: control target
= control target key end

     0   :  { %s1327_s1 = inlined_call_operand.vmem [shape: bf16[384,128], index: 1, kind: input, shape index: {}]   ;;  %s1328_s0 = inlined_call_operand.vmem [shape: bf16[128,384], index: 0, kind: input, shape index: {}]   ;;  %s1329_s2 = inlined_call_operand.vmem [shape: f32[1,128], index: 2, kind: input, shape index: {}]   ;;  %s1330_s3 = inlined_call_operand.vmem [shape: f32[1,128], index: 3, kind: input, shape index: {}]   ;;  %s1331_s4 = inlined_call_operand.vmem [shape: f32[1,128], index: 4, kind: input, shape index: {}]   ;;  %s1332_s5 = inlined_call_operand.vmem [shape: f32[128,128], index: 5, kind: output, shape index: {}]  }
   0x1   :  { %v917_v0 = vld [vmem:[%s1327_s1 + $0x40] sm:$0xff]   ;;  %v919_v2 = vld [vmem:[%s1327_s1 + $0x48] sm:$0xff]   ;;  %v922_v5 = vld [vmem:[%s1327_s1 + $0x50] sm:$0xff]  }
   0x2   :  { %v918_v1 = vld [vmem:[%s1327_s1] sm:$0xff]   ;;  %805 = vmatprep.subr.bf16.mxu0 %v917_v0  ;;  %v921_v4 = vld [vmem:[%s1327_s1 + $0x8] sm:$0xff]   ;;  %v924_v7 = vld [vmem:[%s1327_s1 + $0x10] sm:$0xff]  }
   0x3   :  { %806 = vmatpush3.bf16.msra.mxu0 %v918_v1  ;;  %v920_v3 = vld [vmem:[%s1327_s1 + $0x80] sm:$0xff]   ;;  %v923_v6 = vld [vmem:[%s1327_s1 + $0x88] sm:$0xff]   ;;  %v925_v8 = vld [vmem:[%s1327_s1 + $0x58] sm:$0xff]  }
   0x4   :  { %807 = vmatprep.subr.bf16.mxu0 %v919_v2  ;;  %885 = vmatprep.subr.bf16.mxu1 %v920_v3  ;;  %v926_v9 = vld [vmem:[%s1327_s1 + $0x90] sm:$0xff]   ;;  %v927_v10 = vld [vmem:[%s1327_s1 + $0x18] sm:$0xff]   ;;  %v928_v11 = vld [vmem:[%s1327_s1 + $0x60] sm:$0xff]  }
   0x5   :  { %886 = vmatpush3.bf16.msra.mxu1 %v920_v3  ;;  %v929_v12 = vld [vmem:[%s1327_s1 + $0x98] sm:$0xff]   ;;  %v930_v13 = vld [vmem:[%s1327_s1 + $0x20] sm:$0xff]   ;;  %v931_v15 = vld [vmem:[%s1327_s1 + $0x68] sm:$0xff]  }
   0x6   :  { %887 = vmatprep.subr.bf16.mxu1 %v923_v6  ;;  %v932_v14 = vld [vmem:[%s1327_s1 + $0xa0] sm:$0xff]   ;;  %v933_v16 = vld [vmem:[%s1327_s1 + $0x28] sm:$0xff]   ;;  %v934_v18 = vld [vmem:[%s1327_s1 + $0x70] sm:$0xff]  }
   0x7   :  { %808 = vmatpush3.bf16.msra.mxu0 %v921_v4  ;;  %v935_v17 = vld [vmem:[%s1327_s1 + $0xa8] sm:$0xff]   ;;  %v936_v19 = vld [vmem:[%s1327_s1 + $0x30] sm:$0xff]   ;;  %v937_v20 = vld [vmem:[%s1327_s1 + $0x78] sm:$0xff]  }
   0x8   :  { %809 = vmatprep.subr.bf16.mxu0 %v922_v5  ;;  %v938_v21 = vld [vmem:[%s1327_s1 + $0xb0] sm:$0xff]   ;;  %v939_v23 = vld [vmem:[%s1327_s1 + $0x38] sm:$0xff]   ;;  %v940_v26 = vld [vmem:[%s1328_s0] ss:$12 sps:$4 sm:$0xff]  }
   0x9   :  { %888 = vmatpush3.bf16.msra.mxu1 %v923_v6  ;;  %v942_v22 = vld [vmem:[%s1328_s0 + $0x4] ss:$12 sps:$4 sm:$0xff]   ;;  %v944_v24 = vld [vmem:[%s1328_s0 + $0x8] ss:$12 sps:$4 sm:$0xff]   ;;  %v943_v25 = vld [vmem:[%s1327_s1 + $0xb8] sm:$0xff]  }
   0xa   :  { %889 = vmatprep.subr.bf16.mxu1 %v926_v9  ;;  %412 = vmatprep.mubr.bf16.mxu0 %v942_v22  ;;  %v946_v27 = vld [vmem:[%s1328_s0 + $0x1c] ss:$12 sps:$4 sm:$0xff]   ;;  %v945_v28 = vld [vmem:[%s1328_s0 + $0x20] ss:$12 sps:$4 sm:$0xff]   ;;  %v952_v29 = vld [vmem:[%s1328_s0 + $0x38] ss:$12 sps:$4 sm:$0xff]  }
   0xb   :  { %810 = vmatpush3.bf16.msra.mxu0 %v924_v7  ;;  %901 = vmatprep.mubr.bf16.mxu1 %v944_v24  ;;  %v948_v30 = vld [vmem:[%s1328_s0 + $0x18] ss:$12 sps:$4 sm:$0xff]   ;;  %v949_v31 = vld [vmem:[%s1328_s0 + $0x34] ss:$12 sps:$4 sm:$0xff]   ;;  %v953_v32 = vld [vmem:[%s1328_s0 + $0x50] ss:$12 sps:$4 sm:$0xff]  }
   0xc   :  { %811 = vmatprep.subr.bf16.mxu0 %v925_v8  ;;  %v960_v33 = vld [vmem:[%s1328_s0 + $0x68] ss:$12 sps:$4 sm:$0xff]   ;;  %v951_v34 = vld [vmem:[%s1328_s0 + $0x30] ss:$12 sps:$4 sm:$0xff]   ;;  %v954_v35 = vld [vmem:[%s1328_s0 + $0x4c] ss:$12 sps:$4 sm:$0xff]  }
   0xd   :  { %890 = vmatpush3.bf16.msra.mxu1 %v926_v9  ;;  %v961_v36 = vld [vmem:[%s1328_s0 + $0x80] ss:$12 sps:$4 sm:$0xff]   ;;  %v968_v37 = vld [vmem:[%s1328_s0 + $0x98] ss:$12 sps:$4 sm:$0xff]   ;;  %v956_v38 = vld [vmem:[%s1328_s0 + $0x48] ss:$12 sps:$4 sm:$0xff]  }
   0xe   :  { %891 = vmatprep.subr.bf16.mxu1 %v929_v12  ;;  %v957_v39 = vld [vmem:[%s1328_s0 + $0x64] ss:$12 sps:$4 sm:$0xff]   ;;  %v959_v41 = vld [vmem:[%s1328_s0 + $0x60] ss:$12 sps:$4 sm:$0xff]   ;;  %v962_v42 = vld [vmem:[%s1328_s0 + $0x7c] ss:$12 sps:$4 sm:$0xff]  }
   0xf   :  { %812 = vmatpush3.bf16.msra.mxu0 %v927_v10  ;;  %v969_v40 = vld [vmem:[%s1328_s0 + $0xb0] ss:$12 sps:$4 sm:$0xff]   ;;  %v964_v43 = vld [vmem:[%s1328_s0 + $0x78] ss:$12 sps:$4 sm:$0xff]   ;;  %v965_v44 = vld [vmem:[%s1328_s0 + $0x94] ss:$12 sps:$4 sm:$0xff]  }
  0x10   :  { %813 = vmatprep.subr.bf16.mxu0 %v928_v11  ;;  %v967_v45 = vld [vmem:[%s1328_s0 + $0x90] ss:$12 sps:$4 sm:$0xff]   ;;  %v970_v46 = vld [vmem:[%s1328_s0 + $0xac] ss:$12 sps:$4 sm:$0xff]   ;;  %v972_v47 = vld [vmem:[%s1328_s0 + $0xa8] ss:$12 sps:$4 sm:$0xff]  }
  0x11   :  { %892 = vmatpush3.bf16.msra.mxu1 %v929_v12  ;;  %v1152_v50 = vld [vmem:[%s1329_s2] ss:$0 sm:$0xff] }
  0x12   :  { %893 = vmatprep.subr.bf16.mxu1 %v932_v14 }
  0x13   :  { %814 = vmatpush3.bf16.msra.mxu0 %v930_v13 }
  0x14   :  { %815 = vmatprep.subr.bf16.mxu0 %v931_v15 }
  0x15   :  { %894 = vmatpush3.bf16.msra.mxu1 %v932_v14 }
  0x16   :  { %895 = vmatprep.subr.bf16.mxu1 %v935_v17 }
  0x17   :  { %816 = vmatpush3.bf16.msra.mxu0 %v933_v16 }
  0x18   :  { %817 = vmatprep.subr.bf16.mxu0 %v934_v18 }
  0x19   :  { %896 = vmatpush3.bf16.msra.mxu1 %v935_v17 }
  0x1a   :  { %897 = vmatprep.subr.bf16.mxu1 %v938_v21 }
  0x1b   :  { %818 = vmatpush3.bf16.msra.mxu0 %v936_v19 }
  0x1c   :  { %819 = vmatprep.subr.bf16.mxu0 %v937_v20 }
  0x1d   :  { %898 = vmatpush3.bf16.msra.mxu1 %v938_v21 }
  0x1e   :  { %899 = vmatprep.subr.bf16.mxu1 %v943_v25 }
  0x1f   :  { %820 = vmatpush3.bf16.msra.mxu0 %v939_v23 }
  0x21   :  { %900 = vmatpush3.bf16.msra.mxu1 %v943_v25 }
  0x22   :  { %413 = vmatmul.mubr.bf16.vlgmr.msra.gmra.mrb[0].mxu0 %v940_v26 }
  0x23   :  { %420 = vmatprep.mubr.bf16.mxu0 %v946_v27 }
  0x24   :  { %902 = vmatmul.mubr.bf16.vlgmr.msra.gmra.mrb[0].mxu1 %v945_v28 }
  0x25   :  { %905 = vmatprep.mubr.bf16.mxu1 %v952_v29 }
  0x2a   :  { %421 = vmatmul.mubr.bf16.gmra.mrb[4].mxu0 %v948_v30 }
  0x2b   :  { %428 = vmatprep.mubr.bf16.mxu0 %v949_v31 }
  0x2c   :  { %906 = vmatmul.mubr.bf16.gmra.mrb[4].mxu1 %v953_v32 }
  0x2d   :  { %909 = vmatprep.mubr.bf16.mxu1 %v960_v33 }
  0x32   :  { %429 = vmatmul.mubr.bf16.gmra.mrb[8].mxu0 %v951_v34 }
  0x33   :  { %436 = vmatprep.mubr.bf16.mxu0 %v954_v35 }
  0x34   :  { %910 = vmatmul.mubr.bf16.gmra.mrb[8].mxu1 %v961_v36 }
  0x35   :  { %913 = vmatprep.mubr.bf16.mxu1 %v968_v37 }
  0x3a   :  { %437 = vmatmul.mubr.bf16.gmra.mrb[12].mxu0 %v956_v38 }
  0x3b   :  { %444 = vmatprep.mubr.bf16.mxu0 %v957_v39 }
  0x3c   :  { %914 = vmatmul.mubr.bf16.gmra.mrb[12].mxu1 %v969_v40 }
  0x42   :  { %445 = vmatmul.mubr.bf16.gmra.mrb[16].mxu0 %v959_v41 }
  0x43   :  { %452 = vmatprep.mubr.bf16.mxu0 %v962_v42 }
  0x4a   :  { %453 = vmatmul.mubr.bf16.gmra.mrb[20].mxu0 %v964_v43 }
  0x4b   :  { %460 = vmatprep.mubr.bf16.mxu0 %v965_v44 }
  0x52   :  { %461 = vmatmul.mubr.bf16.gmra.mrb[24].mxu0 %v967_v45 }
  0x53   :  { %468 = vmatprep.mubr.bf16.mxu0 %v970_v46 }
  0x5a   :  { %469 = vmatmul.mubr.bf16.gmra.mrb[28].mxu0 %v972_v47 }
  0xf5   :  { %v821_v48 = vpop.f32.mrb[0].mxu0 }
  0xf6   :  { %v822_v49 = vpop.f32.mrb[1].mxu0 }
  0xf7   :  { %v823_v51 = vadd.f32 %v822_v49, %v821_v48  ;;  %v824_v52 = vpop.f32.mrb[2].mxu0  ;;  %v903_v54 = vpop.f32.mrb[0].mxu1 }
  0xf8   :  { %v825_v53 = vpop.f32.mrb[3].mxu0  ;;  %v511_v57 = vpop.f32.mrb[1].mxu1 }
  0xf9   :  { %v826_v55 = vadd.f32 %v825_v53, %v824_v52  ;;  %v415_v56 = vadd.f32 %v823_v51, %v1152_v50  ;;  %v904_v58 = vpop.f32.mrb[2].mxu1 }
  0xfa   :  { %v514_v61 = vpop.f32.mrb[3].mxu1 }
  0xfb   :  { %v1155_v59 = vadd.f32 %v511_v57, %v415_v56  ;;  %v418_v60 = vadd.f32 %v826_v55, %v1152_v50 }
  0xfd   :  { %v1158_v62 = vadd.f32 %v514_v61, %v418_v60  ;;  %v827_v63 = vpop.f32.mrb[4].mxu0  ;;  %v595_v16 = vmul.f32 %v1155_v59, %v1155_v59 }
  0xfe   :  { %v828_v0 = vpop.f32.mrb[5].mxu0 }
  0xff   :  { %v829_v1 = vadd.f32 %v828_v0, %v827_v63  ;;  %v830_v2 = vpop.f32.mrb[6].mxu0  ;;  %v907_v4 = vpop.f32.mrb[4].mxu1  ;;  %v596_v12 = vmul.f32 %v1158_v62, %v1158_v62  ;;  %v574_v17 = vadd.f32 %v1158_v62, %v1155_v59 }
 0x100   :  { %v831_v3 = vpop.f32.mrb[7].mxu0  ;;  %v527_v7 = vpop.f32.mrb[5].mxu1 }
 0x101   :  { %v423_v5 = vadd.f32 %v829_v1, %v1152_v50  ;;  %v832_v6 = vadd.f32 %v831_v3, %v830_v2  ;;  %v908_v8 = vpop.f32.mrb[6].mxu1  ;;  %v611_v23 = vadd.f32 %v596_v12, %v595_v16 }
 0x102   :  { %v530_v11 = vpop.f32.mrb[7].mxu1 }
 0x103   :  { %v1161_v9 = vadd.f32 %v903_v54, %v423_v5  ;;  %v426_v10 = vadd.f32 %v832_v6, %v1152_v50 }
 0x105   :  { %v1166_v13 = vadd.f32 %v904_v58, %v426_v10  ;;  %v833_v14 = vpop.f32.mrb[8].mxu0  ;;  %v597_v18 = vmul.f32 %v1161_v9, %v1161_v9  ;;  %v575_v26 = vadd.f32 %v574_v17, %v1161_v9 }
 0x106   :  { %v834_v15 = vpop.f32.mrb[9].mxu0 }
 0x107   :  { %v835_v19 = vadd.f32 %v834_v15, %v833_v14  ;;  %v836_v20 = vpop.f32.mrb[10].mxu0  ;;  %v1174_v22 = vpop.f32.mrb[8].mxu1  ;;  %v598_v29 = vmul.f32 %v1166_v13, %v1166_v13  ;;  %v612_v31 = vadd.f32 %v611_v23, %v597_v18  ;;  %v576_v34 = vadd.f32 %v575_v26, %v1166_v13 }
 0x108   :  { %v837_v21 = vpop.f32.mrb[11].mxu0  ;;  %v543_v27 = vpop.f32.mrb[9].mxu1 }
 0x109   :  { %v838_v24 = vadd.f32 %v837_v21, %v836_v20  ;;  %v431_v25 = vadd.f32 %v835_v19, %v1152_v50  ;;  %v912_v28 = vpop.f32.mrb[10].mxu1  ;;  %v613_v40 = vadd.f32 %v612_v31, %v598_v29 }
 0x10a   :  { %v546_v33 = vpop.f32.mrb[11].mxu1 }
 0x10b   :  { %v1180_v30 = vadd.f32 %v527_v7, %v431_v25  ;;  %v434_v32 = vadd.f32 %v838_v24, %v1152_v50 }
 0x10d   :  { %v599_v35 = vmul.f32 %v1180_v30, %v1180_v30  ;;  %v1186_v36 = vadd.f32 %v530_v11, %v434_v32  ;;  %v839_v37 = vpop.f32.mrb[12].mxu0  ;;  %v577_v39 = vadd.f32 %v576_v34, %v1180_v30 }
 0x10e   :  { %v840_v38 = vpop.f32.mrb[13].mxu0 }
 0x10f   :  { %v841_v41 = vadd.f32 %v840_v38, %v839_v37  ;;  %v842_v42 = vpop.f32.mrb[14].mxu0  ;;  %v1189_v44 = vpop.f32.mrb[12].mxu1  ;;  %v614_v45 = vadd.f32 %v613_v40, %v599_v35  ;;  %v600_v46 = vmul.f32 %v1186_v36, %v1186_v36  ;;  %v578_v52 = vadd.f32 %v577_v39, %v1186_v36 }
 0x110   :  { %v843_v43 = vpop.f32.mrb[15].mxu0  ;;  %v559_v49 = vpop.f32.mrb[13].mxu1 }
 0x111   :  { %v439_v47 = vadd.f32 %v841_v41, %v1152_v50  ;;  %v844_v48 = vadd.f32 %v843_v43, %v842_v42  ;;  %v1194_v51 = vpop.f32.mrb[14].mxu1  ;;  %v615_v56 = vadd.f32 %v614_v45, %v600_v46 }
 0x112   :  { %v562_v55 = vpop.f32.mrb[15].mxu1 }
 0x113   :  { %v1197_v53 = vadd.f32 %v907_v4, %v439_v47  ;;  %v442_v54 = vadd.f32 %v844_v48, %v1152_v50 }
 0x115   :  { %v601_v57 = vmul.f32 %v1197_v53, %v1197_v53  ;;  %v1202_v58 = vadd.f32 %v908_v8, %v442_v54  ;;  %v845_v60 = vpop.f32.mrb[16].mxu0  ;;  %v579_v61 = vadd.f32 %v578_v52, %v1197_v53 }
 0x116   :  { %v846_v63 = vpop.f32.mrb[17].mxu0 }
 0x117   :  { %v602_v0 = vmul.f32 %v1202_v58, %v1202_v58  ;;  %v847_v1 = vadd.f32 %v846_v63, %v845_v60  ;;  %v848_v2 = vpop.f32.mrb[18].mxu0  ;;  %v580_v3 = vadd.f32 %v579_v61, %v1202_v58  ;;  %v616_v4 = vadd.f32 %v615_v56, %v601_v57 }
 0x118   :  { %v849_v5 = vpop.f32.mrb[19].mxu0 }
 0x119   :  { %v850_v6 = vadd.f32 %v849_v5, %v848_v2  ;;  %v447_v7 = vadd.f32 %v847_v1, %v1152_v50  ;;  %v617_v10 = vadd.f32 %v616_v4, %v602_v0 }
 0x11b   :  { %v1209_v11 = vadd.f32 %v543_v27, %v447_v7  ;;  %v450_v8 = vadd.f32 %v850_v6, %v1152_v50 }
 0x11d   :  { %v581_v12 = vadd.f32 %v580_v3, %v1209_v11  ;;  %v603_v14 = vmul.f32 %v1209_v11, %v1209_v11  ;;  %v1215_v15 = vadd.f32 %v546_v33, %v450_v8  ;;  %v851_v16 = vpop.f32.mrb[20].mxu0 }
 0x11e   :  { %v852_v17 = vpop.f32.mrb[21].mxu0 }
 0x11f   :  { %v618_v18 = vadd.f32 %v617_v10, %v603_v14  ;;  %v582_v19 = vadd.f32 %v581_v12, %v1215_v15  ;;  %v604_v20 = vmul.f32 %v1215_v15, %v1215_v15  ;;  %v853_v21 = vadd.f32 %v852_v17, %v851_v16  ;;  %v854_v23 = vpop.f32.mrb[22].mxu0 }
 0x120   :  { %v855_v24 = vpop.f32.mrb[23].mxu0 }
 0x121   :  { %v619_v25 = vadd.f32 %v618_v18, %v604_v20  ;;  %v455_v26 = vadd.f32 %v853_v21, %v1152_v50  ;;  %v856_v27 = vadd.f32 %v855_v24, %v854_v23 }
 0x123   :  { %v1222_v29 = vadd.f32 %v1174_v22, %v455_v26  ;;  %v458_v31 = vadd.f32 %v856_v27, %v1152_v50 }
 0x125   :  { %v605_v32 = vmul.f32 %v1222_v29, %v1222_v29  ;;  %v1227_v33 = vadd.f32 %v912_v28, %v458_v31  ;;  %v857_v34 = vpop.f32.mrb[24].mxu0  ;;  %v583_v35 = vadd.f32 %v582_v19, %v1222_v29 }
 0x126   :  { %v858_v37 = vpop.f32.mrb[25].mxu0 }
 0x127   :  { %v606_v38 = vmul.f32 %v1227_v33, %v1227_v33  ;;  %v859_v39 = vadd.f32 %v858_v37, %v857_v34  ;;  %v860_v40 = vpop.f32.mrb[26].mxu0  ;;  %v584_v41 = vadd.f32 %v583_v35, %v1227_v33  ;;  %v620_v22 = vadd.f32 %v619_v25, %v605_v32 }
 0x128   :  { %v861_v42 = vpop.f32.mrb[27].mxu0 }
 0x129   :  { %v862_v43 = vadd.f32 %v861_v42, %v860_v40  ;;  %v463_v45 = vadd.f32 %v859_v39, %v1152_v50  ;;  %v621_v46 = vadd.f32 %v620_v22, %v606_v38  ;;  %v645_v38 = vlaneseq  ;;  %v639_v40 = vld [vmem:[%s1330_s3] sm:$0x1] }
 0x12b   :  { %v1234_v47 = vadd.f32 %v559_v49, %v463_v45  ;;  %v466_v28 = vadd.f32 %v862_v43, %v1152_v50  ;;  %v646_v39 = vshrl.u32 %v645_v38, 7  ;;  %v641_v43 = vld [vmem:[%s1331_s4] sm:$0x1] }
 0x12d   :  { %v585_v48 = vadd.f32 %v584_v41, %v1234_v47  ;;  %v607_v52 = vmul.f32 %v1234_v47, %v1234_v47  ;;  %v563_v54 = vadd.f32 %v562_v55, %v466_v28  ;;  %v863_v56 = vpop.f32.mrb[28].mxu0  ;;  %v647_v41 = vsub.s32 0, %v646_v39 }
 0x12e   :  { %v864_v57 = vpop.f32.mrb[29].mxu0 }
 0x12f   :  { %v622_v60 = vadd.f32 %v621_v46, %v607_v52  ;;  %v586_v61 = vadd.f32 %v585_v48, %v563_v54  ;;  %v608_v63 = vmul.f32 %v563_v54, %v563_v54  ;;  %v865_v0 = vadd.f32 %v864_v57, %v863_v56  ;;  %v866_v1 = vpop.f32.mrb[30].mxu0 }
 0x130   :  { %v867_v2 = vpop.f32.mrb[31].mxu0 }
 0x131   :  { %v623_v3 = vadd.f32 %v622_v60, %v608_v63  ;;  %v471_v49 = vadd.f32 %v865_v0, %v1152_v50  ;;  %v868_v4 = vadd.f32 %v867_v2, %v866_v1 }
 0x133   :  { %v568_v5 = vadd.f32 %v1189_v44, %v471_v49  ;;  %v474_v6 = vadd.f32 %v868_v4, %v1152_v50 }
 0x135   :  { %v587_v7 = vadd.f32 %v586_v61, %v568_v5  ;;  %v609_v10 = vmul.f32 %v568_v5, %v568_v5  ;;  %v571_v55 = vadd.f32 %v1194_v51, %v474_v6 }
 0x137   :  { %v624_v8 = vadd.f32 %v623_v3, %v609_v10  ;;  %v588_v12 = vadd.f32 %v587_v7, %v571_v55  ;;  %v610_v14 = vmul.f32 %v571_v55, %v571_v55 }
 0x139   :  { %v589_v16 = vrot.slane %v588_v12, 4  ;;  %v625_v17 = vadd.f32 %v624_v8, %v610_v14 }
 0x13b   :  { %v590_v18 = vadd.f32 %v589_v16, %v588_v12  ;;  %v626_v19 = vrot.slane %v625_v17, 4 }
 0x13d   :  { %v591_v20 = vrot.slane %v590_v18, 2  ;;  %v627_v21 = vadd.f32 %v626_v19, %v625_v17 }
 0x13f   :  { %v592_v23 = vadd.f32 %v591_v20, %v590_v18  ;;  %v628_v24 = vrot.slane %v627_v21, 2 }
 0x141   :  { %v593_v25 = vrot.slane %v592_v23, 1  ;;  %v629_v26 = vadd.f32 %v628_v24, %v627_v21 }
 0x143   :  { %v594_v44 = vadd.f32 %v593_v25, %v592_v23  ;;  %v630_v27 = vrot.slane %v629_v26, 1 }
 0x145   :  { %v631_v50 = vadd.f32 %v630_v27, %v629_v26  ;;  %v632_v31 = vmul.f32 0.0078125, %v594_v44 }
 0x147   :  { %v633_v32 = vmul.f32 0.0078125, %v631_v50  ;;  %v634_v34 = vmul.f32 %v632_v31, %v632_v31 }
 0x149   :  { %v635_v51 = vsub.f32 %v633_v32, %v634_v34 }
 0x14b   :  { %v636_v35 = vmax.f32 %v635_v51, 0.0 }
 0x14d   :  { %v637_v37 = vadd.f32 1e-05, %v636_v35 }
 0x14f   :  { %973 = vrsqrt.f32 %v637_v37 }
 0x159   :  { %v974_v22 = vpop.eup %973 }
 0x15a   :  { %v640_v42 = vmul.f32 %v974_v22, %v639_v40 }
 0x15c   :  { %v642_v45 = vmul.f32 %v640_v42, %v632_v31  ;;  %v648_v46 = vrot.slane %v640_v42, %v647_v41 }
 0x15e   :  { %v643_v28 = vsub.f32 %v641_v43, %v642_v45  ;;  %v650_v48 = vmul.f32 %v648_v46, %v1155_v59  ;;  %v651_v52 = vmul.f32 %v648_v46, %v1158_v62  ;;  %v655_v56 = vmul.f32 %v648_v46, %v1186_v36 }
 0x15f   :  { %v656_v57 = vmul.f32 %v648_v46, %v1197_v53  ;;  %v657_v60 = vmul.f32 %v648_v46, %v1202_v58  ;;  %v658_v61 = vmul.f32 %v648_v46, %v1209_v11  ;;  %v659_v63 = vmul.f32 %v648_v46, %v1215_v15 }
 0x160   :  { %v660_v0 = vmul.f32 %v648_v46, %v1222_v29  ;;  %v661_v1 = vmul.f32 %v648_v46, %v1227_v33  ;;  %v662_v2 = vmul.f32 %v648_v46, %v1234_v47  ;;  %v663_v3 = vmul.f32 %v648_v46, %v563_v54 }
 0x161   :  { %v664_v59 = vmul.f32 %v648_v46, %v568_v5  ;;  %v652_v62 = vmul.f32 %v648_v46, %v1161_v9  ;;  %v653_v36 = vmul.f32 %v648_v46, %v1166_v13  ;;  %v665_v49 = vmul.f32 %v648_v46, %v571_v55 }
 0x162   :  { %v670_v53 = vrot.slane %v643_v28, %v647_v41  ;;  %v654_v58 = vmul.f32 %v648_v46, %v1180_v30 }
 0x164   :  { %v672_v4 = vadd.f32 %v670_v53, %v650_v48  ;;  %v673_v11 = vadd.f32 %v670_v53, %v651_v52  ;;  %v674_v6 = vadd.f32 %v670_v53, %v652_v62  ;;  %v675_v15 = vadd.f32 %v670_v53, %v653_v36 }
 0x165   :  { %v676_v7 = vadd.f32 %v670_v53, %v654_v58  ;;  %v677_v29 = vadd.f32 %v670_v53, %v655_v56  ;;  %v678_v10 = vadd.f32 %v670_v53, %v656_v57  ;;  %v679_v33 = vadd.f32 %v670_v53, %v657_v60 }
 0x166   :  { %v680_v8 = vadd.f32 %v670_v53, %v658_v61  ;;  %v681_v47 = vadd.f32 %v670_v53, %v659_v63  ;;  %v682_v54 = vadd.f32 %v670_v53, %v660_v0  ;;  %v683_v5 = vadd.f32 %v670_v53, %v661_v1 }
 0x167   :  { %v684_v12 = vadd.f32 %v670_v53, %v662_v2  ;;  %v685_v9 = vadd.f32 %v670_v53, %v663_v3  ;;  %v686_v14 = vadd.f32 %v670_v53, %v664_v59  ;;  %v687_v13 = vadd.f32 %v670_v53, %v665_v49 }
 0x168   :  { %vm688_vm0 = vcmp.ge.f32.partialorder %v672_v4, 0.0  ;;  %vm689_vm1 = vcmp.ge.f32.partialorder %v673_v11, 0.0  ;;  %vm690_vm2 = vcmp.ge.f32.partialorder %v674_v6, 0.0  ;;  %vm691_vm3 = vcmp.ge.f32.partialorder %v675_v15, 0.0 }
 0x169   :  { %vm692_vm4 = vcmp.ge.f32.partialorder %v676_v7, 0.0  ;;  %vm693_vm5 = vcmp.ge.f32.partialorder %v677_v29, 0.0  ;;  %vm694_vm6 = vcmp.ge.f32.partialorder %v678_v10, 0.0  ;;  %vm695_vm7 = vcmp.ge.f32.partialorder %v679_v33, 0.0 }
 0x16a   :  { %vm696_vm8 = vcmp.ge.f32.partialorder %v680_v8, 0.0  ;;  %vm697_vm9 = vcmp.ge.f32.partialorder %v681_v47, 0.0  ;;  %vm698_vm10 = vcmp.ge.f32.partialorder %v682_v54, 0.0  ;;  %vm699_vm11 = vcmp.ge.f32.partialorder %v683_v5, 0.0 }
 0x16b   :  { %vm700_vm12 = vcmp.ge.f32.partialorder %v684_v12, 0.0  ;;  %vm701_vm13 = vcmp.ge.f32.partialorder %v685_v9, 0.0  ;;  %vm702_vm14 = vcmp.ge.f32.partialorder %v686_v14, 0.0  ;;  %vm703_vm15 = vcmp.ge.f32.partialorder %v687_v13, 0.0 }
 0x16c   :  { %v704_v30 = vmul.f32 0.2, %v672_v4  ;;  %v705_v55 = vmul.f32 0.2, %v673_v11  ;;  %v706_v16 = vmul.f32 0.2, %v674_v6 }
 0x16d   :  { %v707_v17 = vmul.f32 0.2, %v675_v15  ;;  %v708_v18 = vmul.f32 0.2, %v676_v7  ;;  %v709_v19 = vmul.f32 0.2, %v677_v29 }
 0x16e   :  { %v710_v20 = vmul.f32 0.2, %v678_v10  ;;  %v711_v21 = vmul.f32 0.2, %v679_v33  ;;  %v712_v23 = vmul.f32 0.2, %v680_v8  ;;  %v720_v24 = vsel %vm688_vm0, %v672_v4, %v704_v30 }
 0x16f   :  { %v713_v25 = vmul.f32 0.2, %v681_v47  ;;  %v714_v26 = vmul.f32 0.2, %v682_v54  ;;  %v715_v44 = vmul.f32 0.2, %v683_v5  ;;  %v721_v27 = vsel %vm689_vm1, %v673_v11, %v705_v55  ;;  %736 = vst [vmem:[%s1332_s5] sm:$0xff] %v720_v24 }
 0x170   :  { %v716_v50 = vmul.f32 0.2, %v684_v12  ;;  %v717_v31 = vmul.f32 0.2, %v685_v9  ;;  %v718_v32 = vmul.f32 0.2, %v686_v14  ;;  %v722_v34 = vsel %vm690_vm2, %v674_v6, %v706_v16 }
 0x171   :  { %737 = vst [vmem:[%s1332_s5 + $0x8] sm:$0xff] %v721_v27  ;;  %v719_v51 = vmul.f32 0.2, %v687_v13  ;;  %v723_v35 = vsel %vm691_vm3, %v675_v15, %v707_v17  ;;  %v724_v37 = vsel %vm692_vm4, %v676_v7, %v708_v18  ;;  %v725_v38 = vsel %vm693_vm5, %v677_v29, %v709_v19  ;;  %738 = vst [vmem:[%s1332_s5 + $0x10] sm:$0xff] %v722_v34 }
 0x172   :  { %v726_v39 = vsel %vm694_vm6, %v678_v10, %v710_v20  ;;  %v727_v40 = vsel %vm695_vm7, %v679_v33, %v711_v21  ;;  %v728_v41 = vsel %vm696_vm8, %v680_v8, %v712_v23  ;;  %v729_v22 = vsel %vm697_vm9, %v681_v47, %v713_v25  ;;  %739 = vst [vmem:[%s1332_s5 + $0x18] sm:$0xff] %v723_v35 }
 0x173   :  { %740 = vst [vmem:[%s1332_s5 + $0x20] sm:$0xff] %v724_v37  ;;  %741 = vst [vmem:[%s1332_s5 + $0x28] sm:$0xff] %v725_v38  ;;  %v730_v42 = vsel %vm698_vm10, %v682_v54, %v714_v26  ;;  %v731_v43 = vsel %vm699_vm11, %v683_v5, %v715_v44  ;;  %v732_v45 = vsel %vm700_vm12, %v684_v12, %v716_v50 }
 0x174   :  { %v733_v46 = vsel %vm701_vm13, %v685_v9, %v717_v31  ;;  %742 = vst [vmem:[%s1332_s5 + $0x30] sm:$0xff] %v726_v39  ;;  %743 = vst [vmem:[%s1332_s5 + $0x38] sm:$0xff] %v727_v40  ;;  %v734_v28 = vsel %vm702_vm14, %v686_v14, %v718_v32  ;;  %v735_v48 = vsel %vm703_vm15, %v687_v13, %v719_v51 }
 0x175   :  { %744 = vst [vmem:[%s1332_s5 + $0x40] sm:$0xff] %v728_v41  ;;  %745 = vst [vmem:[%s1332_s5 + $0x48] sm:$0xff] %v729_v22 }
 0x176   :  { %746 = vst [vmem:[%s1332_s5 + $0x50] sm:$0xff] %v730_v42  ;;  %747 = vst [vmem:[%s1332_s5 + $0x58] sm:$0xff] %v731_v43 }
 0x177   :  { %748 = vst [vmem:[%s1332_s5 + $0x60] sm:$0xff] %v732_v45  ;;  %749 = vst [vmem:[%s1332_s5 + $0x68] sm:$0xff] %v733_v46 }
 0x178   :  { %750 = vst [vmem:[%s1332_s5 + $0x70] sm:$0xff] %v734_v28  ;;  %751 = vst [vmem:[%s1332_s5 + $0x78] sm:$0xff] %v735_v48 }

// kernel: _lambda_.6
= control target key start
LH: loop header
LB: loop body
LE: loop exit
PB: predicated region body
PF: predicated region fallthrough
CT: control target
= control target key end

     0   :  { %s1027_s1 = inlined_call_operand.vmem [shape: bf16[640,128], index: 1, kind: input, shape index: {}]   ;;  %s1028_s0 = inlined_call_operand.vmem [shape: bf16[32,640], index: 0, kind: input, shape index: {}]   ;;  %s1029_s2 = inlined_call_operand.vmem [shape: f32[1,128], index: 2, kind: input, shape index: {}]   ;;  %s1030_s3 = inlined_call_operand.vmem [shape: f32[1,128], index: 3, kind: input, shape index: {}]   ;;  %s1031_s4 = inlined_call_operand.vmem [shape: f32[1,128], index: 4, kind: input, shape index: {}]   ;;  %s1032_s5 = inlined_call_operand.vmem [shape: f32[32,128], index: 5, kind: output, shape index: {}]  }
   0x1   :  { %v770_v0 = vld [vmem:[%s1027_s1 + $0x40] sm:$0xff]   ;;  %v774_v4 = vld [vmem:[%s1027_s1 + $0x48] sm:$0xff]   ;;  %v778_v8 = vld [vmem:[%s1027_s1 + $0x50] sm:$0xff]  }
   0x2   :  { %v771_v1 = vld [vmem:[%s1027_s1] sm:$0xff]   ;;  %684 = vmatprep.subr.bf16.mxu0 %v770_v0  ;;  %v775_v5 = vld [vmem:[%s1027_s1 + $0x8] sm:$0xff]   ;;  %v779_v9 = vld [vmem:[%s1027_s1 + $0x10] sm:$0xff]  }
   0x3   :  { %v772_v2 = vld [vmem:[%s1027_s1 + $0xc0] sm:$0xff]   ;;  %685 = vmatpush3.bf16.msra.mxu0 %v771_v1  ;;  %v776_v6 = vld [vmem:[%s1027_s1 + $0xc8] sm:$0xff]   ;;  %v780_v10 = vld [vmem:[%s1027_s1 + $0xd0] sm:$0xff]  }
   0x4   :  { %v773_v3 = vld [vmem:[%s1027_s1 + $0x80] sm:$0xff]   ;;  %712 = vmatprep.subr.bf16.mxu1 %v772_v2  ;;  %686 = vmatprep.subr.bf16.mxu0 %v774_v4  ;;  %v777_v7 = vld [vmem:[%s1027_s1 + $0x88] sm:$0xff]   ;;  %v781_v11 = vld [vmem:[%s1027_s1 + $0x90] sm:$0xff]  }
   0x5   :  { %713 = vmatpush3.bf16.msra.mxu1 %v773_v3  ;;  %v782_v12 = vld [vmem:[%s1027_s1 + $0x58] sm:$0xff]   ;;  %v786_v16 = vld [vmem:[%s1027_s1 + $0x60] sm:$0xff]   ;;  %v790_v20 = vld [vmem:[%s1027_s1 + $0x68] sm:$0xff]  }
   0x6   :  { %714 = vmatprep.subr.bf16.mxu1 %v776_v6  ;;  %v783_v13 = vld [vmem:[%s1027_s1 + $0x18] sm:$0xff]   ;;  %v787_v17 = vld [vmem:[%s1027_s1 + $0x20] sm:$0xff]   ;;  %v791_v21 = vld [vmem:[%s1027_s1 + $0x28] sm:$0xff]  }
   0x7   :  { %687 = vmatpush3.bf16.msra.mxu0 %v775_v5  ;;  %v784_v14 = vld [vmem:[%s1027_s1 + $0xd8] sm:$0xff]   ;;  %v788_v18 = vld [vmem:[%s1027_s1 + $0xe0] sm:$0xff]   ;;  %v792_v22 = vld [vmem:[%s1027_s1 + $0xe8] sm:$0xff]  }
   0x8   :  { %688 = vmatprep.subr.bf16.mxu0 %v778_v8  ;;  %v785_v15 = vld [vmem:[%s1027_s1 + $0x98] sm:$0xff]   ;;  %v789_v19 = vld [vmem:[%s1027_s1 + $0xa0] sm:$0xff]   ;;  %v793_v23 = vld [vmem:[%s1027_s1 + $0xa8] sm:$0xff]  }
   0x9   :  { %715 = vmatpush3.bf16.msra.mxu1 %v777_v7  ;;  %v794_v24 = vld [vmem:[%s1027_s1 + $0x70] sm:$0xff]   ;;  %v798_v28 = vld [vmem:[%s1027_s1 + $0x78] sm:$0xff]   ;;  %v805_v34 = vld [vmem:[%s1027_s1 + $0x100] sm:$0xff]  }
   0xa   :  { %716 = vmatprep.subr.bf16.mxu1 %v780_v10  ;;  %v795_v25 = vld [vmem:[%s1027_s1 + $0x30] sm:$0xff]   ;;  %v799_v29 = vld [vmem:[%s1027_s1 + $0x38] sm:$0xff]   ;;  %v808_v36 = vld [vmem:[%s1028_s0 + $0xc] ss:$20 sps:$4 sm:$0xff]  }
   0xb   :  { %689 = vmatpush3.bf16.msra.mxu0 %v779_v9  ;;  %v796_v26 = vld [vmem:[%s1027_s1 + $0xf0] sm:$0xff]   ;;  %v800_v30 = vld [vmem:[%s1027_s1 + $0xf8] sm:$0xff]   ;;  %v809_v37 = vld [vmem:[%s1027_s1 + $0x108] sm:$0xff]   ;;  %493 = vmatprep.mubr.bf16.mxu1 %v808_v36 }
   0xc   :  { %690 = vmatprep.subr.bf16.mxu0 %v782_v12  ;;  %v797_v27 = vld [vmem:[%s1027_s1 + $0xb0] sm:$0xff]   ;;  %v803_v32 = vld [vmem:[%s1028_s0 + $0x4] ss:$20 sps:$4 sm:$0xff]   ;;  %v806_v35 = vld [vmem:[%s1028_s0 + $0x8] ss:$20 sps:$4 sm:$0xff]  }
   0xd   :  { %717 = vmatpush3.bf16.msra.mxu1 %v781_v11  ;;  %v801_v31 = vld [vmem:[%s1028_s0] ss:$20 sps:$4 sm:$0xff]   ;;  %v804_v33 = vld [vmem:[%s1027_s1 + $0xb8] sm:$0xff]   ;;  %444 = vmatprep.mubr.bf16.mxu0 %v803_v32  ;;  %v819_v43 = vld [vmem:[%s1028_s0 + $0x30] ss:$20 sps:$4 sm:$0xff]  }
   0xe   :  { %718 = vmatprep.subr.bf16.mxu1 %v784_v14  ;;  %v810_v38 = vld [vmem:[%s1027_s1 + $0x110] sm:$0xff]   ;;  %v813_v39 = vld [vmem:[%s1028_s0 + $0x2c] ss:$20 sps:$4 sm:$0xff]   ;;  %v811_v40 = vld [vmem:[%s1027_s1 + $0x118] sm:$0xff]  }
   0xf   :  { %691 = vmatpush3.bf16.msra.mxu0 %v783_v13  ;;  %v816_v41 = vld [vmem:[%s1028_s0 + $0x28] ss:$20 sps:$4 sm:$0xff]   ;;  %v812_v44 = vld [vmem:[%s1027_s1 + $0x120] sm:$0xff]   ;;  %v820_v47 = vld [vmem:[%s1027_s1 + $0x130] sm:$0xff]  }
  0x10   :  { %692 = vmatprep.subr.bf16.mxu0 %v786_v16  ;;  %v817_v42 = vld [vmem:[%s1028_s0 + $0x34] ss:$20 sps:$4 sm:$0xff]   ;;  %v822_v45 = vld [vmem:[%s1028_s0 + $0x10] ss:$20 sps:$4 sm:$0xff]   ;;  %v821_v48 = vld [vmem:[%s1027_s1 + $0x138] sm:$0xff]  }
  0x11   :  { %719 = vmatpush3.bf16.msra.mxu1 %v785_v15  ;;  %v815_v46 = vld [vmem:[%s1027_s1 + $0x128] sm:$0xff]   ;;  %v633_v51 = vld [vmem:[%s1029_s2] ss:$0 sm:$0xff] }
  0x12   :  { %720 = vmatprep.subr.bf16.mxu1 %v788_v18  ;;  %v823_v49 = vld [vmem:[%s1028_s0 + $0x38] ss:$20 sps:$4 sm:$0xff]  }
  0x13   :  { %693 = vmatpush3.bf16.msra.mxu0 %v787_v17 }
  0x14   :  { %694 = vmatprep.subr.bf16.mxu0 %v790_v20 }
  0x15   :  { %721 = vmatpush3.bf16.msra.mxu1 %v789_v19 }
  0x16   :  { %722 = vmatprep.subr.bf16.mxu1 %v792_v22 }
  0x17   :  { %695 = vmatpush3.bf16.msra.mxu0 %v791_v21 }
  0x18   :  { %696 = vmatprep.subr.bf16.mxu0 %v794_v24 }
  0x19   :  { %723 = vmatpush3.bf16.msra.mxu1 %v793_v23 }
  0x1a   :  { %724 = vmatprep.subr.bf16.mxu1 %v796_v26 }
  0x1b   :  { %697 = vmatpush3.bf16.msra.mxu0 %v795_v25 }
  0x1c   :  { %698 = vmatprep.subr.bf16.mxu0 %v798_v28 }
  0x1d   :  { %725 = vmatpush3.bf16.msra.mxu1 %v797_v27 }
  0x1e   :  { %726 = vmatprep.subr.bf16.mxu1 %v800_v30 }
  0x1f   :  { %699 = vmatpush3.bf16.msra.mxu0 %v799_v29 }
  0x20   :  { %750 = vmatprep.subr.bf16.mxu0 %v805_v34 }
  0x21   :  { %727 = vmatpush3.bf16.msra.mxu1 %v804_v33 }
  0x22   :  { %445 = vmatmul.mubr.bf16.vlgmr.msra.gmra.mrb[0].mxu0 %v801_v31 }
  0x23   :  { %751 = vmatpush3.bf16.msra.mxu0 %v805_v34  ;;  %452 = vmatprep.mubr.bf16.mxu0 %v813_v39 }
  0x24   :  { %494 = vmatmul.mubr.bf16.vlgmr.msra.gmra.mrb[0].mxu1 %v806_v35  ;;  %752 = vmatprep.subr.bf16.mxu0 %v809_v37 }
  0x25   :  { %501 = vmatprep.mubr.bf16.mxu1 %v817_v42 }
  0x27   :  { %753 = vmatpush3.bf16.msra.mxu0 %v809_v37 }
  0x28   :  { %754 = vmatprep.subr.bf16.mxu0 %v810_v38 }
  0x2a   :  { %453 = vmatmul.mubr.bf16.gmra.mrb[4].mxu0 %v816_v41 }
  0x2b   :  { %755 = vmatpush3.bf16.msra.mxu0 %v810_v38  ;;  %766 = vmatprep.mubr.bf16.mxu0 %v822_v45 }
  0x2c   :  { %756 = vmatprep.subr.bf16.mxu0 %v811_v40  ;;  %502 = vmatmul.mubr.bf16.gmra.mrb[4].mxu1 %v819_v43 }
  0x2f   :  { %757 = vmatpush3.bf16.msra.mxu0 %v811_v40 }
  0x30   :  { %758 = vmatprep.subr.bf16.mxu0 %v812_v44 }
  0x33   :  { %759 = vmatpush3.bf16.msra.mxu0 %v812_v44 }
  0x34   :  { %760 = vmatprep.subr.bf16.mxu0 %v815_v46 }
  0x37   :  { %761 = vmatpush3.bf16.msra.mxu0 %v815_v46 }
  0x38   :  { %762 = vmatprep.subr.bf16.mxu0 %v820_v47 }
  0x3b   :  { %763 = vmatpush3.bf16.msra.mxu0 %v820_v47 }
  0x3c   :  { %764 = vmatprep.subr.bf16.mxu0 %v821_v48 }
  0x3f   :  { %765 = vmatpush3.bf16.msra.mxu0 %v821_v48 }
  0x42   :  { %767 = vmatmul.mubr.bf16.vlgmr.msra.gmra.mrb[8].mxu0 %v823_v49 }
  0xf5   :  { %v700_v50 = vpop.f32.mrb[0].mxu0 }
  0xf6   :  { %v701_v52 = vpop.f32.mrb[1].mxu0 }
  0xf7   :  { %v702_v53 = vadd.f32 %v701_v52, %v700_v50  ;;  %v703_v54 = vpop.f32.mrb[2].mxu0  ;;  %v728_v55 = vpop.f32.mrb[0].mxu1 }
  0xf8   :  { %v704_v56 = vpop.f32.mrb[3].mxu0  ;;  %v729_v59 = vpop.f32.mrb[1].mxu1 }
  0xf9   :  { %v447_v57 = vadd.f32 %v702_v53, %v633_v51  ;;  %v705_v58 = vadd.f32 %v704_v56, %v703_v54  ;;  %v730_v60 = vadd.f32 %v729_v59, %v728_v55  ;;  %v731_v61 = vpop.f32.mrb[2].mxu1  ;;  %v594_v55 = vlaneseq }
  0xfa   :  { %v732_v63 = vpop.f32.mrb[3].mxu1 }
  0xfb   :  { %v450_v62 = vadd.f32 %v705_v58, %v633_v51  ;;  %v733_v0 = vadd.f32 %v732_v63, %v731_v61  ;;  %v496_v1 = vadd.f32 %v730_v60, %v447_v57  ;;  %v595_v56 = vshrl.u32 %v594_v55, 7  ;;  %v588_v57 = vld [vmem:[%s1030_s3] sm:$0x1] }
  0xfc   :  { %v590_v61 = vld [vmem:[%s1031_s4] sm:$0x1] }
  0xfd   :  { %v706_v2 = vpop.f32.mrb[4].mxu0  ;;  %v499_v4 = vadd.f32 %v733_v0, %v450_v62  ;;  %v596_v58 = vsub.s32 0, %v595_v56 }
  0xfe   :  { %v707_v3 = vpop.f32.mrb[5].mxu0 }
  0xff   :  { %v708_v5 = vadd.f32 %v707_v3, %v706_v2  ;;  %v709_v6 = vpop.f32.mrb[6].mxu0  ;;  %v734_v7 = vpop.f32.mrb[4].mxu1 }
 0x100   :  { %v710_v8 = vpop.f32.mrb[7].mxu0  ;;  %v735_v11 = vpop.f32.mrb[5].mxu1 }
 0x101   :  { %v455_v9 = vadd.f32 %v708_v5, %v633_v51  ;;  %v711_v10 = vadd.f32 %v710_v8, %v709_v6  ;;  %v736_v12 = vadd.f32 %v735_v11, %v734_v7  ;;  %v737_v13 = vpop.f32.mrb[6].mxu1 }
 0x102   :  { %v738_v15 = vpop.f32.mrb[7].mxu1 }
 0x103   :  { %v458_v14 = vadd.f32 %v711_v10, %v633_v51  ;;  %v739_v16 = vadd.f32 %v738_v15, %v737_v13  ;;  %v504_v17 = vadd.f32 %v736_v12, %v455_v9 }
 0x105   :  { %v507_v18 = vadd.f32 %v739_v16, %v458_v14 }
 0x115   :  { %v768_v19 = vpop.f32.mrb[8].mxu0 }
 0x116   :  { %v553_v20 = vadd.f32 %v768_v19, %v504_v17  ;;  %v544_v21 = vpop.f32.mrb[9].mxu0 }
 0x117   :  { %v545_v22 = vadd.f32 %v544_v21, %v496_v1  ;;  %v769_v23 = vpop.f32.mrb[10].mxu0 }
 0x118   :  { %v556_v24 = vadd.f32 %v769_v23, %v507_v18  ;;  %v547_v25 = vpop.f32.mrb[11].mxu0  ;;  %v570_v30 = vmul.f32 %v553_v20, %v553_v20 }
 0x119   :  { %v548_v26 = vadd.f32 %v547_v25, %v499_v4  ;;  %v568_v27 = vmul.f32 %v545_v22, %v545_v22 }
 0x11a   :  { %v571_v33 = vmul.f32 %v556_v24, %v556_v24 }
 0x11b   :  { %v559_v28 = vadd.f32 %v548_v26, %v545_v22  ;;  %v569_v29 = vmul.f32 %v548_v26, %v548_v26 }
 0x11d   :  { %v560_v31 = vadd.f32 %v559_v28, %v553_v20  ;;  %v572_v32 = vadd.f32 %v569_v29, %v568_v27 }
 0x11f   :  { %v561_v34 = vadd.f32 %v560_v31, %v556_v24  ;;  %v573_v35 = vadd.f32 %v572_v32, %v570_v30 }
 0x121   :  { %v562_v36 = vrot.slane %v561_v34, 4  ;;  %v574_v37 = vadd.f32 %v573_v35, %v571_v33 }
 0x123   :  { %v563_v38 = vadd.f32 %v562_v36, %v561_v34  ;;  %v575_v39 = vrot.slane %v574_v37, 4 }
 0x125   :  { %v564_v40 = vrot.slane %v563_v38, 2  ;;  %v576_v41 = vadd.f32 %v575_v39, %v574_v37 }
 0x127   :  { %v565_v42 = vadd.f32 %v564_v40, %v563_v38  ;;  %v577_v43 = vrot.slane %v576_v41, 2 }
 0x129   :  { %v566_v44 = vrot.slane %v565_v42, 1  ;;  %v578_v45 = vadd.f32 %v577_v43, %v576_v41 }
 0x12b   :  { %v567_v46 = vadd.f32 %v566_v44, %v565_v42  ;;  %v579_v47 = vrot.slane %v578_v45, 1 }
 0x12d   :  { %v580_v48 = vadd.f32 %v579_v47, %v578_v45  ;;  %v581_v49 = vmul.f32 0.03125, %v567_v46 }
 0x12f   :  { %v582_v50 = vmul.f32 0.03125, %v580_v48  ;;  %v583_v51 = vmul.f32 %v581_v49, %v581_v49 }
 0x131   :  { %v584_v52 = vsub.f32 %v582_v50, %v583_v51 }
 0x133   :  { %v585_v53 = vmax.f32 %v584_v52, 0.0 }
 0x135   :  { %v586_v54 = vadd.f32 1e-05, %v585_v53 }
 0x137   :  { %824 = vrsqrt.f32 %v586_v54 }
 0x141   :  { %v825_v59 = vpop.eup %824 }
 0x142   :  { %v589_v60 = vmul.f32 %v825_v59, %v588_v57 }
 0x144   :  { %v591_v62 = vmul.f32 %v589_v60, %v581_v49  ;;  %v597_v63 = vrot.slane %v589_v60, %v596_v58 }
 0x146   :  { %v592_v0 = vsub.f32 %v590_v61, %v591_v62  ;;  %v599_v1 = vmul.f32 %v597_v63, %v545_v22  ;;  %v600_v2 = vmul.f32 %v597_v63, %v548_v26  ;;  %v601_v3 = vmul.f32 %v597_v63, %v553_v20 }
 0x147   :  { %v602_v4 = vmul.f32 %v597_v63, %v556_v24 }
 0x148   :  { %v607_v5 = vrot.slane %v592_v0, %v596_v58 }
 0x14a   :  { %v609_v6 = vadd.f32 %v607_v5, %v599_v1  ;;  %v610_v7 = vadd.f32 %v607_v5, %v600_v2  ;;  %v611_v8 = vadd.f32 %v607_v5, %v601_v3  ;;  %v612_v9 = vadd.f32 %v607_v5, %v602_v4 }
 0x14c   :  { %vm613_vm0 = vcmp.ge.f32.partialorder %v609_v6, 0.0  ;;  %vm614_vm1 = vcmp.ge.f32.partialorder %v610_v7, 0.0  ;;  %vm615_vm2 = vcmp.ge.f32.partialorder %v611_v8, 0.0  ;;  %vm616_vm3 = vcmp.ge.f32.partialorder %v612_v9, 0.0 }
 0x14d   :  { %v617_v10 = vmul.f32 0.2, %v609_v6  ;;  %v618_v11 = vmul.f32 0.2, %v610_v7  ;;  %v619_v12 = vmul.f32 0.2, %v611_v8 }
 0x14e   :  { %v620_v13 = vmul.f32 0.2, %v612_v9 }
 0x14f   :  { %v621_v14 = vsel %vm613_vm0, %v609_v6, %v617_v10  ;;  %v622_v15 = vsel %vm614_vm1, %v610_v7, %v618_v11  ;;  %v623_v16 = vsel %vm615_vm2, %v611_v8, %v619_v12 }
 0x150   :  { %v624_v17 = vsel %vm616_vm3, %v612_v9, %v620_v13  ;;  %625 = vst [vmem:[%s1032_s5] sm:$0xff] %v621_v14  ;;  %626 = vst [vmem:[%s1032_s5 + $0x8] sm:$0xff] %v622_v15 }
 0x151   :  { %627 = vst [vmem:[%s1032_s5 + $0x10] sm:$0xff] %v623_v16  ;;  %628 = vst [vmem:[%s1032_s5 + $0x18] sm:$0xff] %v624_v17 }

// kernel: _lambda_.7
= control target key start
LH: loop header
LB: loop body
LE: loop exit
PB: predicated region body
PF: predicated region fallthrough
CT: control target
= control target key end

     0   :  { %s1732_s0 = inlined_call_operand.vmem [shape: bf16[32,1152], index: 0, kind: input, shape index: {}]   ;;  %s1733_s1 = inlined_call_operand.vmem [shape: bf16[1152,128], index: 1, kind: input, shape index: {}]   ;;  %s1734_s2 = inlined_call_operand.vmem [shape: f32[1,128], index: 2, kind: input, shape index: {}]   ;;  %s1735_s3 = inlined_call_operand.vmem [shape: f32[1,128], index: 3, kind: input, shape index: {}]   ;;  %s1736_s4 = inlined_call_operand.vmem [shape: f32[1,128], index: 4, kind: input, shape index: {}]   ;;  %s1737_s5 = inlined_call_operand.hbm [shape: f32[32,128], index: 5, kind: output, shape index: {}]  }
   0x1   :  { %v1284_v0 = vld [vmem:[%s1733_s1 + $0x40] sm:$0xff]   ;;  %v1288_v4 = vld [vmem:[%s1733_s1 + $0x48] sm:$0xff]   ;;  %v1292_v8 = vld [vmem:[%s1733_s1 + $0x50] sm:$0xff]  }
   0x2   :  { %v1285_v1 = vld [vmem:[%s1733_s1] sm:$0xff]   ;;  %1139 = vmatprep.subr.bf16.mxu0 %v1284_v0  ;;  %v1289_v5 = vld [vmem:[%s1733_s1 + $0x8] sm:$0xff]   ;;  %v1293_v9 = vld [vmem:[%s1733_s1 + $0x10] sm:$0xff]  }
   0x3   :  { %v1286_v2 = vld [vmem:[%s1733_s1 + $0xc0] sm:$0xff]   ;;  %1140 = vmatpush3.bf16.msra.mxu0 %v1285_v1  ;;  %v1290_v6 = vld [vmem:[%s1733_s1 + $0xc8] sm:$0xff]   ;;  %v1294_v10 = vld [vmem:[%s1733_s1 + $0xd0] sm:$0xff]  }
   0x4   :  { %v1287_v3 = vld [vmem:[%s1733_s1 + $0x80] sm:$0xff]   ;;  %1167 = vmatprep.subr.bf16.mxu1 %v1286_v2  ;;  %1141 = vmatprep.subr.bf16.mxu0 %v1288_v4  ;;  %v1291_v7 = vld [vmem:[%s1733_s1 + $0x88] sm:$0xff]   ;;  %v1295_v11 = vld [vmem:[%s1733_s1 + $0x90] sm:$0xff]  }
   0x5   :  { %1168 = vmatpush3.bf16.msra.mxu1 %v1287_v3  ;;  %v1296_v12 = vld [vmem:[%s1733_s1 + $0x58] sm:$0xff]   ;;  %v1300_v16 = vld [vmem:[%s1733_s1 + $0x60] sm:$0xff]   ;;  %v1304_v20 = vld [vmem:[%s1733_s1 + $0x68] sm:$0xff]  }
   0x6   :  { %1169 = vmatprep.subr.bf16.mxu1 %v1290_v6  ;;  %v1297_v13 = vld [vmem:[%s1733_s1 + $0x18] sm:$0xff]   ;;  %v1301_v17 = vld [vmem:[%s1733_s1 + $0x20] sm:$0xff]   ;;  %v1305_v21 = vld [vmem:[%s1733_s1 + $0x28] sm:$0xff]  }
   0x7   :  { %1142 = vmatpush3.bf16.msra.mxu0 %v1289_v5  ;;  %v1298_v14 = vld [vmem:[%s1733_s1 + $0xd8] sm:$0xff]   ;;  %v1302_v18 = vld [vmem:[%s1733_s1 + $0xe0] sm:$0xff]   ;;  %v1306_v22 = vld [vmem:[%s1733_s1 + $0xe8] sm:$0xff]  }
   0x8   :  { %1143 = vmatprep.subr.bf16.mxu0 %v1292_v8  ;;  %v1299_v15 = vld [vmem:[%s1733_s1 + $0x98] sm:$0xff]   ;;  %v1303_v19 = vld [vmem:[%s1733_s1 + $0xa0] sm:$0xff]   ;;  %v1307_v23 = vld [vmem:[%s1733_s1 + $0xa8] sm:$0xff]  }
   0x9   :  { %1170 = vmatpush3.bf16.msra.mxu1 %v1291_v7  ;;  %v1308_v24 = vld [vmem:[%s1733_s1 + $0x70] sm:$0xff]   ;;  %v1312_v28 = vld [vmem:[%s1733_s1 + $0x78] sm:$0xff]   ;;  %v1315_v31 = vld [vmem:[%s1732_s0] ss:$36 sps:$4 sm:$0xff]  }
   0xa   :  { %1171 = vmatprep.subr.bf16.mxu1 %v1294_v10  ;;  %v1309_v25 = vld [vmem:[%s1733_s1 + $0x30] sm:$0xff]   ;;  %v1313_v29 = vld [vmem:[%s1733_s1 + $0x38] sm:$0xff]   ;;  %v1317_v32 = vld [vmem:[%s1732_s0 + $0x4] ss:$36 sps:$4 sm:$0xff]  }
   0xb   :  { %1144 = vmatpush3.bf16.msra.mxu0 %v1293_v9  ;;  %v1310_v26 = vld [vmem:[%s1733_s1 + $0xf0] sm:$0xff]   ;;  %v1314_v30 = vld [vmem:[%s1733_s1 + $0xf8] sm:$0xff]   ;;  %749 = vmatprep.mubr.bf16.mxu0 %v1317_v32  ;;  %v1319_v34 = vld [vmem:[%s1733_s1 + $0x140] sm:$0xff]  }
   0xc   :  { %1145 = vmatprep.subr.bf16.mxu0 %v1296_v12  ;;  %v1311_v27 = vld [vmem:[%s1733_s1 + $0xb0] sm:$0xff]   ;;  %v1318_v33 = vld [vmem:[%s1733_s1 + $0xb8] sm:$0xff]   ;;  %v1320_v35 = vld [vmem:[%s1732_s0 + $0x8] ss:$36 sps:$4 sm:$0xff]  }
   0xd   :  { %1172 = vmatpush3.bf16.msra.mxu1 %v1295_v11  ;;  %v1322_v36 = vld [vmem:[%s1732_s0 + $0xc] ss:$36 sps:$4 sm:$0xff]   ;;  %v1323_v37 = vld [vmem:[%s1733_s1 + $0x100] sm:$0xff]   ;;  %v1334_v48 = vld [vmem:[%s1733_s1 + $0x158] sm:$0xff]  }
   0xe   :  { %1173 = vmatprep.subr.bf16.mxu1 %v1298_v14  ;;  %798 = vmatprep.mubr.bf16.mxu1 %v1322_v36  ;;  %v1324_v38 = vld [vmem:[%s1733_s1 + $0x1c0] sm:$0xff]   ;;  %v1326_v40 = vld [vmem:[%s1733_s1 + $0x148] sm:$0xff]   ;;  %v1330_v44 = vld [vmem:[%s1733_s1 + $0x150] sm:$0xff]  }
   0xf   :  { %1146 = vmatpush3.bf16.msra.mxu0 %v1297_v13  ;;  %v1325_v39 = vld [vmem:[%s1733_s1 + $0x180] sm:$0xff]   ;;  %v1327_v41 = vld [vmem:[%s1733_s1 + $0x108] sm:$0xff]   ;;  %v1331_v45 = vld [vmem:[%s1733_s1 + $0x110] sm:$0xff]  }
  0x10   :  { %1147 = vmatprep.subr.bf16.mxu0 %v1300_v16  ;;  %v1328_v42 = vld [vmem:[%s1733_s1 + $0x1c8] sm:$0xff]   ;;  %v1332_v46 = vld [vmem:[%s1733_s1 + $0x1d0] sm:$0xff]   ;;  %v1335_v49 = vld [vmem:[%s1733_s1 + $0x118] sm:$0xff]  }
  0x11   :  { %1174 = vmatpush3.bf16.msra.mxu1 %v1299_v15  ;;  %v1329_v43 = vld [vmem:[%s1733_s1 + $0x188] sm:$0xff]   ;;  %v1333_v47 = vld [vmem:[%s1733_s1 + $0x190] sm:$0xff]   ;;  %v1336_v50 = vld [vmem:[%s1733_s1 + $0x1d8] sm:$0xff]  }
  0x12   :  { %1175 = vmatprep.subr.bf16.mxu1 %v1302_v18  ;;  %v1337_v51 = vld [vmem:[%s1733_s1 + $0x198] sm:$0xff]   ;;  %v1338_v52 = vld [vmem:[%s1733_s1 + $0x160] sm:$0xff]   ;;  %v1342_v56 = vld [vmem:[%s1733_s1 + $0x168] sm:$0xff]  }
  0x13   :  { %1148 = vmatpush3.bf16.msra.mxu0 %v1301_v17  ;;  %v1339_v53 = vld [vmem:[%s1733_s1 + $0x120] sm:$0xff]   ;;  %v1343_v57 = vld [vmem:[%s1732_s0 + $0x4c] ss:$36 sps:$4 sm:$0xff]   ;;  %v1348_v61 = vld [vmem:[%s1732_s0 + $0x54] ss:$36 sps:$4 sm:$0xff]  }
  0x14   :  { %1149 = vmatprep.subr.bf16.mxu0 %v1304_v20  ;;  %v1340_v54 = vld [vmem:[%s1733_s1 + $0x1e0] sm:$0xff]   ;;  %v1345_v58 = vld [vmem:[%s1733_s1 + $0x128] sm:$0xff]   ;;  %v1351_v63 = vld [vmem:[%s1732_s0 + $0x50] ss:$36 sps:$4 sm:$0xff]  }
  0x15   :  { %1176 = vmatpush3.bf16.msra.mxu1 %v1303_v19  ;;  %v1341_v55 = vld [vmem:[%s1733_s1 + $0x1a0] sm:$0xff]   ;;  %v1346_v59 = vld [vmem:[%s1732_s0 + $0x48] ss:$36 sps:$4 sm:$0xff]   ;;  %v1352_v0 = vld [vmem:[%s1733_s1 + $0x170] sm:$0xff]  }
  0x16   :  { %1177 = vmatprep.subr.bf16.mxu1 %v1306_v22  ;;  %v1347_v60 = vld [vmem:[%s1733_s1 + $0x1e8] sm:$0xff]   ;;  %v1353_v1 = vld [vmem:[%s1733_s1 + $0x130] sm:$0xff]   ;;  %v1356_v4 = vld [vmem:[%s1733_s1 + $0x178] sm:$0xff]  }
  0x17   :  { %1150 = vmatpush3.bf16.msra.mxu0 %v1305_v21  ;;  %v1350_v62 = vld [vmem:[%s1733_s1 + $0x1a8] sm:$0xff]   ;;  %v1354_v2 = vld [vmem:[%s1733_s1 + $0x1f0] sm:$0xff]   ;;  %v1357_v5 = vld [vmem:[%s1733_s1 + $0x138] sm:$0xff]  }
  0x18   :  { %1151 = vmatprep.subr.bf16.mxu0 %v1308_v24  ;;  %v1355_v3 = vld [vmem:[%s1733_s1 + $0x1b0] sm:$0xff]   ;;  %v1358_v6 = vld [vmem:[%s1733_s1 + $0x1f8] sm:$0xff]   ;;  %v1363_v10 = vld [vmem:[%s1733_s1 + $0x200] sm:$0xff]  }
  0x19   :  { %1178 = vmatpush3.bf16.msra.mxu1 %v1307_v23  ;;  %v1359_v7 = vld [vmem:[%s1732_s0 + $0x10] ss:$36 sps:$4 sm:$0xff]   ;;  %v1362_v9 = vld [vmem:[%s1733_s1 + $0x1b8] sm:$0xff]   ;;  %v1367_v13 = vld [vmem:[%s1733_s1 + $0x208] sm:$0xff]  }
  0x1a   :  { %1179 = vmatprep.subr.bf16.mxu1 %v1310_v26  ;;  %v1361_v8 = vld [vmem:[%s1732_s0 + $0x14] ss:$36 sps:$4 sm:$0xff]   ;;  %v1366_v12 = vld [vmem:[%s1732_s0 + $0x1c] ss:$36 sps:$4 sm:$0xff]   ;;  %v1372_v17 = vld [vmem:[%s1732_s0 + $0x64] ss:$36 sps:$4 sm:$0xff]  }
  0x1b   :  { %1152 = vmatpush3.bf16.msra.mxu0 %v1309_v25  ;;  %v1364_v11 = vld [vmem:[%s1732_s0 + $0x18] ss:$36 sps:$4 sm:$0xff]   ;;  %v1371_v16 = vld [vmem:[%s1733_s1 + $0x210] sm:$0xff]   ;;  %v1374_v18 = vld [vmem:[%s1732_s0 + $0x60] ss:$36 sps:$4 sm:$0xff]  }
  0x1c   :  { %1153 = vmatprep.subr.bf16.mxu0 %v1312_v28  ;;  %v1368_v14 = vld [vmem:[%s1732_s0 + $0x5c] ss:$36 sps:$4 sm:$0xff]  }
  0x1d   :  { %1180 = vmatpush3.bf16.msra.mxu1 %v1311_v27  ;;  %v1370_v15 = vld [vmem:[%s1732_s0 + $0x58] ss:$36 sps:$4 sm:$0xff]   ;;  %v1376_v20 = vld [vmem:[%s1733_s1 + $0x220] sm:$0xff]  }
  0x1e   :  { %1181 = vmatprep.subr.bf16.mxu1 %v1314_v30  ;;  %v1375_v19 = vld [vmem:[%s1733_s1 + $0x218] sm:$0xff]   ;;  %v1380_v21 = vld [vmem:[%s1732_s0 + $0x20] ss:$36 sps:$4 sm:$0xff]  }
  0x1f   :  { %1154 = vmatpush3.bf16.msra.mxu0 %v1313_v29 }
  0x20   :  { %1195 = vmatprep.subr.bf16.mxu0 %v1319_v34 }
  0x21   :  { %1182 = vmatpush3.bf16.msra.mxu1 %v1318_v33 }
  0x22   :  { %750 = vmatmul.mubr.bf16.vlgmr.msra.gmra.mrb[0].mxu0 %v1315_v31  ;;  %1223 = vmatprep.subr.bf16.mxu1 %v1324_v38 }
  0x23   :  { %1196 = vmatpush3.bf16.msra.mxu0 %v1323_v37  ;;  %757 = vmatprep.mubr.bf16.mxu0 %v1343_v57 }
  0x24   :  { %799 = vmatmul.mubr.bf16.vlgmr.msra.gmra.mrb[0].mxu1 %v1320_v35  ;;  %1197 = vmatprep.subr.bf16.mxu0 %v1326_v40 }
  0x25   :  { %1224 = vmatpush3.bf16.msra.mxu1 %v1325_v39  ;;  %806 = vmatprep.mubr.bf16.mxu1 %v1348_v61 }
  0x26   :  { %1225 = vmatprep.subr.bf16.mxu1 %v1328_v42 }
  0x27   :  { %1198 = vmatpush3.bf16.msra.mxu0 %v1327_v41 }
  0x28   :  { %1199 = vmatprep.subr.bf16.mxu0 %v1330_v44 }
  0x29   :  { %1226 = vmatpush3.bf16.msra.mxu1 %v1329_v43 }
  0x2a   :  { %1227 = vmatprep.subr.bf16.mxu1 %v1332_v46  ;;  %758 = vmatmul.mubr.bf16.gmra.mrb[4].mxu0 %v1346_v59 }
  0x2b   :  { %1200 = vmatpush3.bf16.msra.mxu0 %v1331_v45  ;;  %847 = vmatprep.mubr.bf16.mxu0 %v1361_v8 }
  0x2c   :  { %1201 = vmatprep.subr.bf16.mxu0 %v1334_v48  ;;  %807 = vmatmul.mubr.bf16.gmra.mrb[4].mxu1 %v1351_v63 }
  0x2d   :  { %1228 = vmatpush3.bf16.msra.mxu1 %v1333_v47  ;;  %896 = vmatprep.mubr.bf16.mxu1 %v1366_v12 }
  0x2e   :  { %1229 = vmatprep.subr.bf16.mxu1 %v1336_v50 }
  0x2f   :  { %1202 = vmatpush3.bf16.msra.mxu0 %v1335_v49 }
  0x30   :  { %1203 = vmatprep.subr.bf16.mxu0 %v1338_v52 }
  0x31   :  { %1230 = vmatpush3.bf16.msra.mxu1 %v1337_v51 }
  0x32   :  { %1231 = vmatprep.subr.bf16.mxu1 %v1340_v54 }
  0x33   :  { %1204 = vmatpush3.bf16.msra.mxu0 %v1339_v53 }
  0x34   :  { %1205 = vmatprep.subr.bf16.mxu0 %v1342_v56 }
  0x35   :  { %1232 = vmatpush3.bf16.msra.mxu1 %v1341_v55 }
  0x36   :  { %1233 = vmatprep.subr.bf16.mxu1 %v1347_v60 }
  0x37   :  { %1206 = vmatpush3.bf16.msra.mxu0 %v1345_v58 }
  0x38   :  { %1207 = vmatprep.subr.bf16.mxu0 %v1352_v0 }
  0x39   :  { %1234 = vmatpush3.bf16.msra.mxu1 %v1350_v62 }
  0x3a   :  { %1235 = vmatprep.subr.bf16.mxu1 %v1354_v2 }
  0x3b   :  { %1208 = vmatpush3.bf16.msra.mxu0 %v1353_v1 }
  0x3c   :  { %1209 = vmatprep.subr.bf16.mxu0 %v1356_v4 }
  0x3d   :  { %1236 = vmatpush3.bf16.msra.mxu1 %v1355_v3 }
  0x3e   :  { %1237 = vmatprep.subr.bf16.mxu1 %v1358_v6 }
  0x3f   :  { %1210 = vmatpush3.bf16.msra.mxu0 %v1357_v5 }
  0x40   :  { %1261 = vmatprep.subr.bf16.mxu0 %v1363_v10 }
  0x41   :  { %1238 = vmatpush3.bf16.msra.mxu1 %v1362_v9 }
  0x42   :  { %848 = vmatmul.mubr.bf16.vlgmr.msra.gmra.mrb[8].mxu0 %v1359_v7 }
  0x43   :  { %1262 = vmatpush3.bf16.msra.mxu0 %v1363_v10  ;;  %855 = vmatprep.mubr.bf16.mxu0 %v1368_v14 }
  0x44   :  { %897 = vmatmul.mubr.bf16.vlgmr.msra.gmra.mrb[8].mxu1 %v1364_v11  ;;  %1263 = vmatprep.subr.bf16.mxu0 %v1367_v13 }
  0x45   :  { %904 = vmatprep.mubr.bf16.mxu1 %v1372_v17 }
  0x47   :  { %1264 = vmatpush3.bf16.msra.mxu0 %v1367_v13 }
  0x48   :  { %1265 = vmatprep.subr.bf16.mxu0 %v1371_v16 }
  0x4a   :  { %856 = vmatmul.mubr.bf16.gmra.mrb[12].mxu0 %v1370_v15 }
  0x4b   :  { %1266 = vmatpush3.bf16.msra.mxu0 %v1371_v16 }
  0x4c   :  { %905 = vmatmul.mubr.bf16.gmra.mrb[12].mxu1 %v1374_v18  ;;  %1267 = vmatprep.subr.bf16.mxu0 %v1375_v19 }
  0x4d   :  { %10 = vsyncpa [#allocation3], 0  ;;  %1277 = vmatprep.mubr.bf16.mxu0 %v1380_v21  ;;  %v1377_v22 = vld [vmem:[%s1733_s1 + $0x228] sm:$0xff]   ;;  %v1378_v23 = vld [vmem:[%s1733_s1 + $0x230] sm:$0xff]  }
  0x4e   :  { %v1379_v24 = vld [vmem:[%s1733_s1 + $0x238] sm:$0xff]   ;;  %v1381_v25 = vld [vmem:[%s1732_s0 + $0x68] ss:$36 sps:$4 sm:$0xff]   ;;  %v1048_v27 = vld [vmem:[%s1734_s2] ss:$0 sm:$0xff] }
  0x4f   :  { %1268 = vmatpush3.bf16.msra.mxu0 %v1375_v19 }
  0x50   :  { %1269 = vmatprep.subr.bf16.mxu0 %v1376_v20 }
  0x53   :  { %1270 = vmatpush3.bf16.msra.mxu0 %v1376_v20 }
  0x54   :  { %1271 = vmatprep.subr.bf16.mxu0 %v1377_v22 }
  0x57   :  { %1272 = vmatpush3.bf16.msra.mxu0 %v1377_v22 }
  0x58   :  { %1273 = vmatprep.subr.bf16.mxu0 %v1378_v23 }
  0x5b   :  { %1274 = vmatpush3.bf16.msra.mxu0 %v1378_v23 }
  0x5c   :  { %1275 = vmatprep.subr.bf16.mxu0 %v1379_v24 }
  0x5f   :  { %1276 = vmatpush3.bf16.msra.mxu0 %v1379_v24 }
  0x62   :  { %1278 = vmatmul.mubr.bf16.vlgmr.msra.gmra.mrb[16].mxu0 %v1381_v25 }
  0xf5   :  { %v1155_v26 = vpop.f32.mrb[0].mxu0 }
  0xf6   :  { %v1156_v28 = vpop.f32.mrb[1].mxu0 }
  0xf7   :  { %v1157_v29 = vadd.f32 %v1156_v28, %v1155_v26  ;;  %v1158_v30 = vpop.f32.mrb[2].mxu0  ;;  %v1183_v31 = vpop.f32.mrb[0].mxu1 }
  0xf8   :  { %v1159_v32 = vpop.f32.mrb[3].mxu0  ;;  %v1184_v35 = vpop.f32.mrb[1].mxu1 }
  0xf9   :  { %v752_v33 = vadd.f32 %v1157_v29, %v1048_v27  ;;  %v1160_v34 = vadd.f32 %v1159_v32, %v1158_v30  ;;  %v1185_v36 = vadd.f32 %v1184_v35, %v1183_v31  ;;  %v1186_v37 = vpop.f32.mrb[2].mxu1 }
  0xfa   :  { %v1187_v39 = vpop.f32.mrb[3].mxu1 }
  0xfb   :  { %v755_v38 = vadd.f32 %v1160_v34, %v1048_v27  ;;  %v801_v40 = vadd.f32 %v1185_v36, %v752_v33  ;;  %v1188_v41 = vadd.f32 %v1187_v39, %v1186_v37 }
  0xfd   :  { %v804_v42 = vadd.f32 %v1188_v41, %v755_v38  ;;  %v1161_v43 = vpop.f32.mrb[4].mxu0 }
  0xfe   :  { %v1162_v44 = vpop.f32.mrb[5].mxu0 }
  0xff   :  { %v1163_v45 = vadd.f32 %v1162_v44, %v1161_v43  ;;  %v1164_v46 = vpop.f32.mrb[6].mxu0  ;;  %v1189_v47 = vpop.f32.mrb[4].mxu1 }
 0x100   :  { %v1165_v48 = vpop.f32.mrb[7].mxu0  ;;  %v1190_v51 = vpop.f32.mrb[5].mxu1 }
 0x101   :  { %v760_v49 = vadd.f32 %v1163_v45, %v1048_v27  ;;  %v1166_v50 = vadd.f32 %v1165_v48, %v1164_v46  ;;  %v1191_v52 = vadd.f32 %v1190_v51, %v1189_v47  ;;  %v1192_v53 = vpop.f32.mrb[6].mxu1 }
 0x102   :  { %v1193_v55 = vpop.f32.mrb[7].mxu1 }
 0x103   :  { %v763_v54 = vadd.f32 %v1166_v50, %v1048_v27  ;;  %v809_v56 = vadd.f32 %v1191_v52, %v760_v49  ;;  %v1194_v57 = vadd.f32 %v1193_v55, %v1192_v53 }
 0x105   :  { %v812_v58 = vadd.f32 %v1194_v57, %v763_v54 }
 0x115   :  { %v1211_v59 = vpop.f32.mrb[8].mxu0 }
 0x116   :  { %v1212_v60 = vpop.f32.mrb[9].mxu0 }
 0x117   :  { %v1213_v61 = vadd.f32 %v1212_v60, %v1211_v59  ;;  %v1214_v62 = vpop.f32.mrb[10].mxu0  ;;  %v1239_v63 = vpop.f32.mrb[8].mxu1 }
 0x118   :  { %v1215_v0 = vpop.f32.mrb[11].mxu0  ;;  %v1240_v3 = vpop.f32.mrb[9].mxu1 }
 0x119   :  { %v850_v1 = vadd.f32 %v1213_v61, %v801_v40  ;;  %v1216_v2 = vadd.f32 %v1215_v0, %v1214_v62  ;;  %v1241_v4 = vadd.f32 %v1240_v3, %v1239_v63  ;;  %v1242_v5 = vpop.f32.mrb[10].mxu1  ;;  %v997_v63 = vlaneseq }
 0x11a   :  { %v1243_v7 = vpop.f32.mrb[11].mxu1 }
 0x11b   :  { %v853_v6 = vadd.f32 %v1216_v2, %v804_v42  ;;  %v1244_v8 = vadd.f32 %v1243_v7, %v1242_v5  ;;  %v899_v9 = vadd.f32 %v1241_v4, %v850_v1  ;;  %v998_v0 = vshrl.u32 %v997_v63, 7  ;;  %v991_v1 = vld [vmem:[%s1735_s3] sm:$0x1]  ;;  %s1408_s3 = smov [#allocation2]  }
 0x11c   :  { %v993_v5 = vld [vmem:[%s1736_s4] sm:$0x1]  ;;  %s1037_s26 = sshll.u32 %s1408_s3, 4  ;;  %s1038_s26 = int_to_ptr.vmem [resolvable:$true] %s1037_s26 }
 0x11d   :  { %v1217_v10 = vpop.f32.mrb[12].mxu0  ;;  %v902_v12 = vadd.f32 %v1244_v8, %v853_v6  ;;  %v999_v2 = vsub.s32 0, %v998_v0  ;;  %s1384_s4 = scalar_lea.vmem %s1038_s26, 512  ;;  %p1389_p1 = scmp.lt.s32.totalorder %s1038_s26, %s1038_s26 }
 0x11e   :  { %v1218_v11 = vpop.f32.mrb[13].mxu0  ;;  %p1385_p0 = scmp.ne.s32.totalorder %s1038_s26, %s1384_s4  ;;  %p1390_p2 = scmp.lt.s32.totalorder %s1384_s4, %s1384_s4 }
 0x11f   :  { %v1219_v13 = vadd.f32 %v1218_v11, %v1217_v10  ;;  %v1220_v14 = vpop.f32.mrb[14].mxu0  ;;  %v1245_v15 = vpop.f32.mrb[12].mxu1 }
 0x120   :  { %v1221_v16 = vpop.f32.mrb[15].mxu0  ;;  %v1246_v19 = vpop.f32.mrb[13].mxu1  ;;  %p1391_p3 = por %p1390_p2, %p1389_p1 }
 0x121   :  { %v858_v17 = vadd.f32 %v1219_v13, %v809_v56  ;;  %v1222_v18 = vadd.f32 %v1221_v16, %v1220_v14  ;;  %v1247_v20 = vadd.f32 %v1246_v19, %v1245_v15  ;;  %v1248_v21 = vpop.f32.mrb[14].mxu1 }
 0x122   :  { %v1249_v23 = vpop.f32.mrb[15].mxu1  ;;  %p1392_p4 = pnand %p1391_p3, %p1385_p0 }
 0x123   :  { %v861_v22 = vadd.f32 %v1222_v18, %v812_v58  ;;  %v1250_v24 = vadd.f32 %v1249_v23, %v1248_v21  ;;  %v907_v25 = vadd.f32 %v1247_v20, %v858_v17 }
 0x125   :  { %v910_v26 = vadd.f32 %v1250_v24, %v861_v22 }
 0x135   :  { %v1279_v27 = vpop.f32.mrb[16].mxu0 }
 0x136   :  { %v956_v28 = vadd.f32 %v1279_v27, %v907_v25  ;;  %v947_v29 = vpop.f32.mrb[17].mxu0 }
 0x137   :  { %v948_v30 = vadd.f32 %v947_v29, %v899_v9  ;;  %v1280_v31 = vpop.f32.mrb[18].mxu0 }
 0x138   :  { %v959_v32 = vadd.f32 %v1280_v31, %v910_v26  ;;  %v950_v33 = vpop.f32.mrb[19].mxu0  ;;  %v973_v38 = vmul.f32 %v956_v28, %v956_v28 }
 0x139   :  { %v951_v34 = vadd.f32 %v950_v33, %v902_v12  ;;  %v971_v35 = vmul.f32 %v948_v30, %v948_v30 }
 0x13a   :  { %v974_v41 = vmul.f32 %v959_v32, %v959_v32 }
 0x13b   :  { %v962_v36 = vadd.f32 %v951_v34, %v948_v30  ;;  %v972_v37 = vmul.f32 %v951_v34, %v951_v34 }
 0x13d   :  { %v963_v39 = vadd.f32 %v962_v36, %v956_v28  ;;  %v975_v40 = vadd.f32 %v972_v37, %v971_v35 }
 0x13f   :  { %v964_v42 = vadd.f32 %v963_v39, %v959_v32  ;;  %v976_v43 = vadd.f32 %v975_v40, %v973_v38 }
 0x141   :  { %v965_v44 = vrot.slane %v964_v42, 4  ;;  %v977_v45 = vadd.f32 %v976_v43, %v974_v41 }
 0x143   :  { %v966_v46 = vadd.f32 %v965_v44, %v964_v42  ;;  %v978_v47 = vrot.slane %v977_v45, 4 }
 0x145   :  { %v967_v48 = vrot.slane %v966_v46, 2  ;;  %v979_v49 = vadd.f32 %v978_v47, %v977_v45 }
 0x147   :  { %v968_v50 = vadd.f32 %v967_v48, %v966_v46  ;;  %v980_v51 = vrot.slane %v979_v49, 2 }
 0x149   :  { %v969_v52 = vrot.slane %v968_v50, 1  ;;  %v981_v53 = vadd.f32 %v980_v51, %v979_v49 }
 0x14b   :  { %v970_v54 = vadd.f32 %v969_v52, %v968_v50  ;;  %v982_v55 = vrot.slane %v981_v53, 1 }
 0x14d   :  { %v983_v56 = vadd.f32 %v982_v55, %v981_v53  ;;  %v984_v57 = vmul.f32 0.03125, %v970_v54 }
 0x14f   :  { %v985_v58 = vmul.f32 0.03125, %v983_v56  ;;  %v986_v59 = vmul.f32 %v984_v57, %v984_v57 }
 0x151   :  { %v987_v60 = vsub.f32 %v985_v58, %v986_v59 }
 0x153   :  { %v988_v61 = vmax.f32 %v987_v60, 0.0 }
 0x155   :  { %v989_v62 = vadd.f32 1e-05, %v988_v61 }
 0x157   :  { %1382 = vrsqrt.f32 %v989_v62 }
 0x161   :  { %v1383_v3 = vpop.eup %1382 }
 0x162   :  { %v992_v4 = vmul.f32 %v1383_v3, %v991_v1 }
 0x164   :  { %v994_v6 = vmul.f32 %v992_v4, %v984_v57  ;;  %v1000_v7 = vrot.slane %v992_v4, %v999_v2 }
 0x166   :  { %v995_v8 = vsub.f32 %v993_v5, %v994_v6  ;;  %v1002_v9 = vmul.f32 %v1000_v7, %v948_v30  ;;  %v1003_v10 = vmul.f32 %v1000_v7, %v951_v34  ;;  %v1004_v11 = vmul.f32 %v1000_v7, %v956_v28 }
 0x167   :  { %v1005_v12 = vmul.f32 %v1000_v7, %v959_v32 }
 0x168   :  { %v1010_v13 = vrot.slane %v995_v8, %v999_v2 }
 0x16a   :  { %v1013_v14 = vadd.f32 %v1010_v13, %v1003_v10  ;;  %v1012_v15 = vadd.f32 %v1010_v13, %v1002_v9  ;;  %v1014_v16 = vadd.f32 %v1010_v13, %v1004_v11  ;;  %v1015_v17 = vadd.f32 %v1010_v13, %v1005_v12 }
 0x16c   :  { %vm1017_vm0 = vcmp.ge.f32.partialorder %v1013_v14, 0.0  ;;  %v1021_v18 = vmul.f32 0.2, %v1013_v14  ;;  %vm1016_vm1 = vcmp.ge.f32.partialorder %v1012_v15, 0.0  ;;  %vm1018_vm2 = vcmp.ge.f32.partialorder %v1014_v16, 0.0 }
 0x16d   :  { %vm1019_vm3 = vcmp.ge.f32.partialorder %v1015_v17, 0.0  ;;  %v1020_v19 = vmul.f32 0.2, %v1012_v15  ;;  %v1022_v20 = vmul.f32 0.2, %v1014_v16 }
 0x16e   :  { %v1025_v21 = vsel %vm1017_vm0, %v1013_v14, %v1021_v18  ;;  %v1023_v22 = vmul.f32 0.2, %v1015_v17 }
 0x16f   :  { %1029 = vst [vmem:[#allocation2 + $0x8] sm:$0xff] %v1025_v21  ;;  %v1024_v23 = vsel %vm1016_vm1, %v1012_v15, %v1020_v19  ;;  %v1026_v24 = vsel %vm1018_vm2, %v1014_v16, %v1022_v20 }
 0x170   :  { %v1027_v25 = vsel %vm1019_vm3, %v1015_v17, %v1023_v22  ;;  %1028 = vst [vmem:[#allocation2] sm:$0xff] %v1024_v23  ;;  %1030 = vst [vmem:[#allocation2 + $0x10] sm:$0xff] %v1026_v24 }
 0x171   :  { %1031 = vst [vmem:[#allocation2 + $0x18] sm:$0xff] %v1027_v25 }
 0x172   :  { %1395 = shalt.err (!%p1392_p4)
}
 0x173   :  { %s1396_s29 = scalar_lea.hbm %s1737_s5, 512 }
 0x174   :  { %p1397_p5 = scmp.ne.s32.totalorder %s1737_s5, %s1396_s29  ;;  %p1400_p6 = scmp.lt.u32.totalorder %s1396_s29, %s1737_s5 }
 0x176   :  { %p1402_p7 = pnand %p1400_p6, %p1397_p5 }
 0x178   :  { %1405 = shalt.err (!%p1402_p7)
}
 0x179   :  { %s1409_s9 = smov 128   ;;  %s1410_s10 = smov 8  }
 0x17a   :  { %1043 = dma.vmem_to_hbm [thread:$0]  %s1038_s26, 512, %s1737_s5, [#allocation3], %s1409_s9, %s1409_s9, %s1410_s10  }
 0x17b   :  { %1406 = dma.done.wait [#allocation3], 512  }
 0x17c   :  { %1407 = vsyncadd [#allocation3], 4294966784 }
 0x17d   :  { %1047 = vsyncpa [#allocation3], 1 }

</bundles_post_ra>
